<compile_context>
chip_gen: v5e
topology: v5e:2x2
jax: 0.10.0
libtpu: 0.0.40
codegen_flags: <defaults>
</compile_context>

<pallas_src>
import functools

import jax
import jax.numpy as jnp
from jax import lax
from jax.experimental import pallas as pl
from jax.experimental.pallas import tpu as pltpu


# ---------------------------------------------------------------------------
# kernel
# ---------------------------------------------------------------------------
def _mpnn_kernel(hV_ref, hE_ref, ma_ref, mv_ref,
                 W1V_ref, W1E_ref, W2_ref, W3_ref, Win_ref, Wout_ref,
                 vecs_ref, bin_ref, out_ref, *, eps, k_chunk):
    f32, bf16 = jnp.float32, jnp.bfloat16

    hV = hV_ref[...]                               # (TM, H)  f32
    TM, H = hV.shape
    K = hE_ref.shape[1]
    C = hE_ref.shape[2]

    vecs = vecs_ref[...]                           # (8, H)  f32
    b1, b2, b3, bout = vecs[0:1], vecs[1:2], vecs[2:3], vecs[3:4]
    g0, be0, g1, be1 = vecs[4:5], vecs[5:6], vecs[6:7], vecs[7:8]

    # --- message MLP: W3(relu(W2(relu(W1([hV, hE]))))) ----------------------
    # W1 split: node half applied once per row (bf16 MXU feed, fp32 accum).
    msgV = jnp.dot(hV.astype(bf16), W1V_ref[...],
                   preferred_element_type=f32) + b1            # (TM, H)

    w_all = ma_ref[...]                            # (TM, K, 1) f32 (= mask/scale)
    wsum = jnp.sum(w_all, axis=1)                  # (TM, 1)

    def msg_chunk(hE_c, w_c, kc):
        # hE_c: (TM, kc, C) bf16   w_c: (TM, kc, 1) f32
        h1 = jnp.dot(hE_c.reshape(TM * kc, C), W1E_ref[...],
                     preferred_element_type=f32).reshape(TM, kc, H)
        h1 = jnp.maximum(h1 + msgV[:, None, :], 0.0)
        h2 = jnp.dot(h1.astype(bf16).reshape(TM * kc, H), W2_ref[...],
                     preferred_element_type=f32).reshape(TM, kc, H)
        h2 = jnp.maximum(h2 + b2[:, None, :], 0.0)
        # apply the (mask/scale) weight while still (TM, kc, H), reduce over K
        return jnp.sum(h2 * w_c, axis=1)           # (TM, H) f32

    n_chunks = K // k_chunk
    if n_chunks <= 1:
        s_acc = msg_chunk(hE_ref[...], w_all, K)
    else:
        def body(c, acc):
            start = pl.multiple_of(c * k_chunk, k_chunk)
            hE_c = hE_ref[:, pl.ds(start, k_chunk), :]
            w_c = ma_ref[:, pl.ds(start, k_chunk), :]
            return acc + msg_chunk(hE_c, w_c, k_chunk)
        s_acc = lax.fori_loop(0, n_chunks, body, jnp.zeros((TM, H), f32))

    # W3 hoisted out of the per-neighbor path (linearity): one (TM,H)@(H,H)
    # matmul; b3 scaled by the per-row weight sum keeps it exactly equivalent.
    dh = jnp.dot(s_acc.astype(bf16), W3_ref[...],
                 preferred_element_type=f32) + wsum * b3       # (TM, H)

    # TODO(synk): dropout(dh) is identity here (eval mode).

    # --- residual + Normalize[0]  (torch.var unbiased /(H-1); sigma+eps) ----
    x = hV + dh
    mu = jnp.mean(x, axis=-1, keepdims=True)
    var = jnp.sum((x - mu) ** 2, axis=-1, keepdims=True) * (1.0 / (H - 1))
    inv = pl.reciprocal(jnp.sqrt(var + eps) + eps, approx=True)   # (TM,1), EUP
    x = (x - mu) * (g0 * inv) + be0

    # --- PositionWiseFeedForward ---------------------------------------------
    hff = jnp.dot(x.astype(bf16), Win_ref[...],
                  preferred_element_type=f32) + bin_ref[...]
    hff = jnp.maximum(hff, 0.0)
    dh2 = jnp.dot(hff.astype(bf16), Wout_ref[...],
                  preferred_element_type=f32) + bout

    # --- residual + Normalize[1] ---------------------------------------------
    y = x + dh2
    mu2 = jnp.mean(y, axis=-1, keepdims=True)
    var2 = jnp.sum((y - mu2) ** 2, axis=-1, keepdims=True) * (1.0 / (H - 1))
    inv2 = pl.reciprocal(jnp.sqrt(var2 + eps) + eps, approx=True)
    y = (y - mu2) * (g1 * inv2) + be1

    out_ref[...] = (y * mv_ref[...]).astype(out_ref.dtype)


# ---------------------------------------------------------------------------
# wrapper helpers
# ---------------------------------------------------------------------------
def _round_up(x, m):
    return (x + m - 1) // m * m


def _cdiv(a, b):
    return (a + b - 1) // b


def _pick_k_chunk(K, k_chunk=None):
    if k_chunk is not None:
        if K % k_chunk == 0 and (k_chunk == K or k_chunk % 8 == 0):
            return int(k_chunk)
        return K                      # invalid request -> single pass
    if K <= 16:
        return K
    for kc in (16, 8):                # chunk must divide K and stay 8-aligned
        if K % kc == 0:
            return kc
    return K


def _vmem_capacity_bytes():
    try:
        cap = getattr(pltpu.get_tpu_info(), "vmem_capacity_bytes", None)
        if cap:
            return int(cap)
    except Exception:
        pass
    return 64 * 1024 * 1024           # conservative (v7x-sized) default


def _vmem_footprint(tm, K, C, H, kc):
    bf2, f4 = 2, 4
    stream = 2 * (tm * K * C * bf2            # h_E tile (dominant stream)
                  + tm * H * f4               # h_V tile
                  + tm * K * f4 + tm * f4     # masks
                  + tm * H * f4)              # output tile
    weights = 2 * ((3 * H * H + C * H + 8 * H * H) * bf2 + 12 * H * f4)
    inter = (3 * tm * kc * H + 6 * tm * H + 2 * tm * 4 * H) * f4
    return stream + weights + inter


# ---------------------------------------------------------------------------
# wrapper
# ---------------------------------------------------------------------------
def mpnn_layer_pallas(h_V, h_E, mask_V, mask_attend, params,
                      scale=30.0, eps=1e-6, tm=512, k_chunk=None,
                      hE_buffers=2):
    B, N, H = h_V.shape
    K, C = h_E.shape[2], h_E.shape[3]
    M = B * N

    (W1, b1, W2, b2, W3, b3, Win, bin_, Wout, bout,
     g0, be0, g1, be1) = params

    kc = _pick_k_chunk(K, k_chunk)

    # Weights: split W1 into node/edge halves; all matmul weights in bf16.
    W1_V = W1[:H, :].astype(jnp.bfloat16)
    W1_E = W1[H:, :].astype(jnp.bfloat16)
    W2b = W2.astype(jnp.bfloat16)
    W3b = W3.astype(jnp.bfloat16)
    Winb = Win.astype(jnp.bfloat16)
    Woutb = Wout.astype(jnp.bfloat16)
    vecsH = jnp.concatenate([b1, b2, b3, bout, g0, be0, g1, be1],
                            axis=0).astype(jnp.float32)         # (8, H)
    binf = bin_.astype(jnp.float32)                              # (1, 4H)

    # Activations: dominant h_E stream in bf16 (pass bf16 in to skip the cast
    # copy); 1/scale folded into mask_attend; NO host-side padding.
    hV2 = h_V.reshape(M, H).astype(jnp.float32)
    hE2 = h_E.reshape(M, K, C)
    if hE2.dtype != jnp.bfloat16:
        hE2 = hE2.astype(jnp.bfloat16)
    ma2 = (mask_attend.reshape(M, K, 1) / scale).astype(jnp.float32)
    mv2 = mask_V.reshape(M, 1).astype(jnp.float32)

    # Row tile: as large as the VMEM budget allows; prefer an even grid count
    # (v7x has 2 TensorCores sharing the "parallel" grid axis) by shrinking
    # the tile, never by adding padded work.
    vmem_limit = min(int(0.75 * _vmem_capacity_bytes()), 96 * 1024 * 1024)
    tm_eff = _round_up(min(int(tm), _round_up(M, 8)), 8)
    while tm_eff > 64 and _vmem_footprint(tm_eff, K, C, H, kc) > vmem_limit:
        tm_eff = _round_up(tm_eff // 2, 8)

    g = _cdiv(M, tm_eff)
    if g == 1 and M > 8:
        tm_eff = _round_up(_cdiv(M, 2), 8)
        g = _cdiv(M, tm_eff)
    elif g > 1 and g % 2 == 1:
        tm_try = _round_up(_cdiv(M, g + 1), 8)
        if _cdiv(M, tm_try) % 2 == 0:
            tm_eff, g = tm_try, _cdiv(M, tm_try)

    full = lambda a: pl.BlockSpec(a.shape, lambda i: (0,) * a.ndim)

    hE_spec_kwargs = {}
    if hE_buffers != 2:   # optional deeper pipelining of the dominant stream
        hE_spec_kwargs["pipeline_mode"] = pl.Buffered(hE_buffers)

    in_specs = [
        pl.BlockSpec((tm_eff, H), lambda i: (i, 0)),              # h_V
        pl.BlockSpec((tm_eff, K, C), lambda i: (i, 0, 0),
                     **hE_spec_kwargs),                           # h_E (bf16)
        pl.BlockSpec((tm_eff, K, 1), lambda i: (i, 0, 0)),        # mask/scale
        pl.BlockSpec((tm_eff, 1), lambda i: (i, 0)),              # mask_V
        full(W1_V), full(W1_E), full(W2b), full(W3b), full(Winb), full(Woutb),
        full(vecsH), full(binf),
    ]
    out_spec = pl.BlockSpec((tm_eff, H), lambda i: (i, 0))

    # Advisory cost hint for XLA scheduling around the custom call.
    flops = 2 * M * (K * (C * H + H * H) + 10 * H * H)
    bytes_accessed = (hV2.size * 4 + hE2.size * 2 + ma2.size * 4 + mv2.size * 4
                      + M * H * 4
                      + 2 * (3 * H * H + C * H + 8 * H * H) + 12 * H * 4)
    cost = pl.CostEstimate(flops=flops, transcendentals=4 * M,
                           bytes_accessed=bytes_accessed)

    kernel = functools.partial(_mpnn_kernel, eps=float(eps), k_chunk=kc)

    out = pl.pallas_call(
        kernel,
        out_shape=jax.ShapeDtypeStruct((M, H), jnp.float32),
        grid_spec=pltpu.PrefetchScalarGridSpec(
            num_scalar_prefetch=0,
            grid=(g,),
            in_specs=in_specs,
            out_specs=out_spec,
        ),
        compiler_params=pltpu.CompilerParams(
            dimension_semantics=("parallel",),
            vmem_limit_bytes=vmem_limit,
        ),
        cost_estimate=cost,
    )(hV2, hE2, ma2, mv2,
      W1_V, W1_E, W2b, W3b, Winb, Woutb, vecsH, binf)

    return out.reshape(B, N, H)


# ---------------------------------------------------------------------------
# pure-JAX fp32 reference (mirrors the PyTorch forward in eval mode)
# ---------------------------------------------------------------------------
def mpnn_layer_ref(h_V, h_E, mask_V, mask_attend, params, scale=30.0, eps=1e-6):
    (W1, b1, W2, b2, W3, b3, Win, bin_, Wout, bout,
     g0, be0, g1, be1) = params
    B, N, H = h_V.shape
    K = h_E.shape[2]

    def norm(x, g, b):
        mu = jnp.mean(x, -1, keepdims=True)
        var = jnp.sum((x - mu) ** 2, -1, keepdims=True) / (x.shape[-1] - 1)
        sigma = jnp.sqrt(var + eps)
        return g * (x - mu) / (sigma + eps) + b

    hV_exp = jnp.broadcast_to(h_V[:, :, None, :], (B, N, K, H))
    hEV = jnp.concatenate([hV_exp, h_E], -1)
    h = jnp.maximum(hEV @ W1 + b1, 0.0)
    h = jnp.maximum(h @ W2 + b2, 0.0)
    h_msg = h @ W3 + b3
    h_msg = mask_attend[..., None] * h_msg
    dh = jnp.sum(h_msg, -2) / scale
    x = norm(h_V + dh, g0, be0)
    dh2 = jnp.maximum(x @ Win + bin_, 0.0) @ Wout + bout
    y = norm(x + dh2, g1, be1)
    return mask_V[..., None] * y


def init_params(key, num_hidden, num_in):
    H, C = num_hidden, num_in
    ks = jax.random.split(key, 10)
    s = 0.1
    W1 = s * jax.random.normal(ks[0], (H + C, H), jnp.float32)
    b1 = s * jax.random.normal(ks[1], (1, H), jnp.float32)
    W2 = s * jax.random.normal(ks[2], (H, H), jnp.float32)
    b2 = s * jax.random.normal(ks[3], (1, H), jnp.float32)
    W3 = s * jax.random.normal(ks[4], (H, H), jnp.float32)
    b3 = s * jax.random.normal(ks[5], (1, H), jnp.float32)
    Win = s * jax.random.normal(ks[6], (H, 4 * H), jnp.float32)
    bin_ = s * jax.random.normal(ks[7], (1, 4 * H), jnp.float32)
    Wout = s * jax.random.normal(ks[8], (4 * H, H), jnp.float32)
    bout = s * jax.random.normal(ks[9], (1, H), jnp.float32)
    g0 = jnp.ones((1, H), jnp.float32)
    be0 = jnp.zeros((1, H), jnp.float32)
    g1 = jnp.ones((1, H), jnp.float32)
    be1 = jnp.zeros((1, H), jnp.float32)
    return (W1, b1, W2, b2, W3, b3, Win, bin_, Wout, bout, g0, be0, g1, be1)


if __name__ == "__main__":
    # ----- config 1: small demo (single-chunk message path, even grid) -----
    B, N, K = 2, 16, 8
    num_hidden, num_in = 32, 64

    key = jax.random.PRNGKey(0)
    k1, k2, k3, k4, kp = jax.random.split(key, 5)
    h_V = jax.random.normal(k1, (B, N, num_hidden), jnp.float32)
    h_E = jax.random.normal(k2, (B, N, K, num_in), jnp.float32)
    mask_attend = (jax.random.uniform(k3, (B, N, K)) > 0.2).astype(jnp.float32)
    mask_V = (jax.random.uniform(k4, (B, N)) > 0.1).astype(jnp.float32)

    params = init_params(kp, num_hidden, num_in)

    out = jax.block_until_ready(
        mpnn_layer_pallas(h_V, h_E, mask_V, mask_attend, params))
    ref = mpnn_layer_ref(h_V, h_E, mask_V, mask_attend, params)
    # bf16 MXU feeds + approx reciprocal -> relaxed tolerance vs fp32 ref.
    assert jnp.allclose(out, ref, rtol=2e-2, atol=2e-2), "mismatch (config 1)"

    # ----- config 2: exercises the K-chunked (fori_loop) message path and a
    # ragged last row-tile (no host-side padding). ---------------------------
    B2, N2, K2 = 1, 13, 16
    kk = jax.random.split(jax.random.PRNGKey(1), 4)
    h_V2 = jax.random.normal(kk[0], (B2, N2, num_hidden), jnp.float32)
    h_E2 = jax.random.normal(kk[1], (B2, N2, K2, num_in), jnp.float32)
    ma_2 = (jax.random.uniform(kk[2], (B2, N2, K2)) > 0.3).astype(jnp.float32)
    mv_2 = (jax.random.uniform(kk[3], (B2, N2)) > 0.1).astype(jnp.float32)

    out2 = jax.block_until_ready(
        mpnn_layer_pallas(h_V2, h_E2, mv_2, ma_2, params, k_chunk=8))
    ref2 = mpnn_layer_ref(h_V2, h_E2, mv_2, ma_2, params)
    assert jnp.allclose(out2, ref2, rtol=2e-2, atol=2e-2), "mismatch (config 2)"

    print("KERNEL_OK")
</pallas_src>

<mosaic_0001>
module attributes {stable_mosaic.version = 11 : i64} {
  func.func @_mpnn_kernel(%arg0: i32, %arg1: memref<16x32xf32, #tpu.memory_space<vmem>>, %arg2: memref<16x8x64xbf16, #tpu.memory_space<vmem>>, %arg3: memref<16x8x1xf32, #tpu.memory_space<vmem>>, %arg4: memref<16x1xf32, #tpu.memory_space<vmem>>, %arg5: memref<32x32xbf16, #tpu.memory_space<vmem>>, %arg6: memref<64x32xbf16, #tpu.memory_space<vmem>>, %arg7: memref<32x32xbf16, #tpu.memory_space<vmem>>, %arg8: memref<32x32xbf16, #tpu.memory_space<vmem>>, %arg9: memref<32x128xbf16, #tpu.memory_space<vmem>>, %arg10: memref<128x32xbf16, #tpu.memory_space<vmem>>, %arg11: memref<8x32xf32, #tpu.memory_space<vmem>>, %arg12: memref<1x128xf32, #tpu.memory_space<vmem>>, %arg13: memref<16x32xf32, #tpu.memory_space<vmem>>) attributes {dimension_semantics = [#tpu.dimension_semantics<parallel>], iteration_bounds = array<i64: 2>, scalar_prefetch = 0 : i64, scratch_operands = 0 : i64, tpu.core_type = #tpu.core_type<tc>, window_params = [{transform_indices = @transform_0, window_bounds = array<i64: 16, 32>}, {transform_indices = @transform_1, window_bounds = array<i64: 16, 8, 64>}, {transform_indices = @transform_2, window_bounds = array<i64: 16, 8, 1>}, {transform_indices = @transform_3, window_bounds = array<i64: 16, 1>}, {pipeline_mode = #tpu.pipeline_mode<synchronous>, transform_indices = @transform_4, window_bounds = array<i64: 32, 32>}, {pipeline_mode = #tpu.pipeline_mode<synchronous>, transform_indices = @transform_5, window_bounds = array<i64: 64, 32>}, {pipeline_mode = #tpu.pipeline_mode<synchronous>, transform_indices = @transform_6, window_bounds = array<i64: 32, 32>}, {pipeline_mode = #tpu.pipeline_mode<synchronous>, transform_indices = @transform_7, window_bounds = array<i64: 32, 32>}, {pipeline_mode = #tpu.pipeline_mode<synchronous>, transform_indices = @transform_8, window_bounds = array<i64: 32, 128>}, {pipeline_mode = #tpu.pipeline_mode<synchronous>, transform_indices = @transform_9, window_bounds = array<i64: 128, 32>}, {pipeline_mode = #tpu.pipeline_mode<synchronous>, transform_indices = @transform_10, window_bounds = array<i64: 8, 32>}, {pipeline_mode = #tpu.pipeline_mode<synchronous>, transform_indices = @transform_11, window_bounds = array<i64: 1, 128>}, {transform_indices = @transform_12, window_bounds = array<i64: 16, 32>}]} {
    %c0 = arith.constant 0 : index
    %c0_0 = arith.constant 0 : index
    %0 = vector.load %arg1[%c0, %c0_0] : memref<16x32xf32, #tpu.memory_space<vmem>>, vector<16x32xf32>
    %c0_1 = arith.constant 0 : index
    %c0_2 = arith.constant 0 : index
    %1 = vector.load %arg11[%c0_1, %c0_2] : memref<8x32xf32, #tpu.memory_space<vmem>>, vector<8x32xf32>
    %2 = vector.extract_strided_slice %1 {offsets = [0, 0], sizes = [1, 32], strides = [1, 1]} : vector<8x32xf32> to vector<1x32xf32>
    %3 = vector.extract_strided_slice %1 {offsets = [1, 0], sizes = [1, 32], strides = [1, 1]} : vector<8x32xf32> to vector<1x32xf32>
    %4 = vector.extract_strided_slice %1 {offsets = [2, 0], sizes = [1, 32], strides = [1, 1]} : vector<8x32xf32> to vector<1x32xf32>
    %5 = vector.extract_strided_slice %1 {offsets = [3, 0], sizes = [1, 32], strides = [1, 1]} : vector<8x32xf32> to vector<1x32xf32>
    %6 = vector.extract_strided_slice %1 {offsets = [4, 0], sizes = [1, 32], strides = [1, 1]} : vector<8x32xf32> to vector<1x32xf32>
    %7 = vector.extract_strided_slice %1 {offsets = [5, 0], sizes = [1, 32], strides = [1, 1]} : vector<8x32xf32> to vector<1x32xf32>
    %8 = vector.extract_strided_slice %1 {offsets = [6, 0], sizes = [1, 32], strides = [1, 1]} : vector<8x32xf32> to vector<1x32xf32>
    %9 = vector.extract_strided_slice %1 {offsets = [7, 0], sizes = [1, 32], strides = [1, 1]} : vector<8x32xf32> to vector<1x32xf32>
    %10 = arith.truncf %0 : vector<16x32xf32> to vector<16x32xbf16>
    %c0_3 = arith.constant 0 : index
    %c0_4 = arith.constant 0 : index
    %11 = vector.load %arg5[%c0_3, %c0_4] : memref<32x32xbf16, #tpu.memory_space<vmem>>, vector<32x32xbf16>
    %cst = arith.constant dense<0.000000e+00> : vector<16x32xf32>
    %12 = tpu.matmul %10, %11, %cst {dimension_numbers = #tpu.dot_dimension_numbers<[1], [0], [0], [1], [0, 0, 1, 1], [], []>} : vector<16x32xbf16>, vector<32x32xbf16>, vector<16x32xf32> -> vector<16x32xf32>
    %13 = vector.broadcast %2 : vector<1x32xf32> to vector<16x32xf32>
    %14 = arith.addf %12, %13 : vector<16x32xf32>
    %c0_5 = arith.constant 0 : index
    %c0_6 = arith.constant 0 : index
    %c0_7 = arith.constant 0 : index
    %15 = vector.load %arg3[%c0_5, %c0_6, %c0_7] : memref<16x8x1xf32, #tpu.memory_space<vmem>>, vector<16x8x1xf32>
    %cst_8 = arith.constant dense<0.000000e+00> : vector<16x1xf32>
    %16 = vector.multi_reduction <add>, %15, %cst_8 [1] : vector<16x8x1xf32> to vector<16x1xf32>
    %c0_9 = arith.constant 0 : index
    %c0_10 = arith.constant 0 : index
    %c0_11 = arith.constant 0 : index
    %17 = vector.load %arg2[%c0_9, %c0_10, %c0_11] : memref<16x8x64xbf16, #tpu.memory_space<vmem>>, vector<16x8x64xbf16>
    %18 = vector.shape_cast %17 : vector<16x8x64xbf16> to vector<128x64xbf16>
    %c0_12 = arith.constant 0 : index
    %c0_13 = arith.constant 0 : index
    %19 = vector.load %arg6[%c0_12, %c0_13] : memref<64x32xbf16, #tpu.memory_space<vmem>>, vector<64x32xbf16>
    %cst_14 = arith.constant dense<0.000000e+00> : vector<128x32xf32>
    %20 = tpu.matmul %18, %19, %cst_14 {dimension_numbers = #tpu.dot_dimension_numbers<[1], [0], [0], [1], [0, 0, 1, 1], [], []>} : vector<128x64xbf16>, vector<64x32xbf16>, vector<128x32xf32> -> vector<128x32xf32>
    %21 = vector.shape_cast %20 : vector<128x32xf32> to vector<16x8x32xf32>
    %22 = vector.shape_cast %14 : vector<16x32xf32> to vector<16x1x32xf32>
    %23 = vector.broadcast %22 : vector<16x1x32xf32> to vector<16x8x32xf32>
    %24 = arith.addf %21, %23 : vector<16x8x32xf32>
    %cst_15 = arith.constant 0.000000e+00 : f32
    %25 = vector.broadcast %cst_15 : f32 to vector<16x8x32xf32>
    %26 = arith.maximumf %24, %25 : vector<16x8x32xf32>
    %27 = arith.truncf %26 : vector<16x8x32xf32> to vector<16x8x32xbf16>
    %28 = vector.shape_cast %27 : vector<16x8x32xbf16> to vector<128x32xbf16>
    %c0_16 = arith.constant 0 : index
    %c0_17 = arith.constant 0 : index
    %29 = vector.load %arg7[%c0_16, %c0_17] : memref<32x32xbf16, #tpu.memory_space<vmem>>, vector<32x32xbf16>
    %cst_18 = arith.constant dense<0.000000e+00> : vector<128x32xf32>
    %30 = tpu.matmul %28, %29, %cst_18 {dimension_numbers = #tpu.dot_dimension_numbers<[1], [0], [0], [1], [0, 0, 1, 1], [], []>} : vector<128x32xbf16>, vector<32x32xbf16>, vector<128x32xf32> -> vector<128x32xf32>
    %31 = vector.shape_cast %30 : vector<128x32xf32> to vector<16x8x32xf32>
    %32 = vector.shape_cast %3 : vector<1x32xf32> to vector<1x1x32xf32>
    %33 = vector.broadcast %32 : vector<1x1x32xf32> to vector<16x8x32xf32>
    %34 = arith.addf %31, %33 : vector<16x8x32xf32>
    %cst_19 = arith.constant 0.000000e+00 : f32
    %35 = vector.broadcast %cst_19 : f32 to vector<16x8x32xf32>
    %36 = arith.maximumf %34, %35 : vector<16x8x32xf32>
    %37 = vector.broadcast %15 : vector<16x8x1xf32> to vector<16x8x32xf32>
    %38 = arith.mulf %36, %37 : vector<16x8x32xf32>
    %cst_20 = arith.constant dense<0.000000e+00> : vector<16x32xf32>
    %39 = vector.multi_reduction <add>, %38, %cst_20 [1] : vector<16x8x32xf32> to vector<16x32xf32>
    %40 = arith.truncf %39 : vector<16x32xf32> to vector<16x32xbf16>
    %c0_21 = arith.constant 0 : index
    %c0_22 = arith.constant 0 : index
    %41 = vector.load %arg8[%c0_21, %c0_22] : memref<32x32xbf16, #tpu.memory_space<vmem>>, vector<32x32xbf16>
    %cst_23 = arith.constant dense<0.000000e+00> : vector<16x32xf32>
    %42 = tpu.matmul %40, %41, %cst_23 {dimension_numbers = #tpu.dot_dimension_numbers<[1], [0], [0], [1], [0, 0, 1, 1], [], []>} : vector<16x32xbf16>, vector<32x32xbf16>, vector<16x32xf32> -> vector<16x32xf32>
    %43 = vector.broadcast %16 : vector<16x1xf32> to vector<16x32xf32>
    %44 = vector.broadcast %4 : vector<1x32xf32> to vector<16x32xf32>
    %45 = arith.mulf %43, %44 : vector<16x32xf32>
    %46 = arith.addf %42, %45 : vector<16x32xf32>
    %47 = arith.addf %0, %46 : vector<16x32xf32>
    %cst_24 = arith.constant dense<0.000000e+00> : vector<16xf32>
    %48 = vector.multi_reduction <add>, %47, %cst_24 [1] : vector<16x32xf32> to vector<16xf32>
    %49 = vector.shape_cast %48 : vector<16xf32> to vector<16x1xf32>
    %cst_25 = arith.constant 3.200000e+01 : f32
    %50 = vector.broadcast %cst_25 : f32 to vector<16x1xf32>
    %51 = arith.divf %49, %50 : vector<16x1xf32>
    %52 = vector.broadcast %51 : vector<16x1xf32> to vector<16x32xf32>
    %53 = arith.subf %47, %52 : vector<16x32xf32>
    %54 = arith.mulf %53, %53 : vector<16x32xf32>
    %cst_26 = arith.constant dense<0.000000e+00> : vector<16xf32>
    %55 = vector.multi_reduction <add>, %54, %cst_26 [1] : vector<16x32xf32> to vector<16xf32>
    %56 = vector.shape_cast %55 : vector<16xf32> to vector<16x1xf32>
    %cst_27 = arith.constant 0.0322580636 : f32
    %57 = vector.broadcast %cst_27 : f32 to vector<16x1xf32>
    %58 = arith.mulf %56, %57 : vector<16x1xf32>
    %cst_28 = arith.constant 9.99999997E-7 : f32
    %59 = vector.broadcast %cst_28 : f32 to vector<16x1xf32>
    %60 = arith.addf %58, %59 : vector<16x1xf32>
    %61 = math.sqrt %60 : vector<16x1xf32>
    %cst_29 = arith.constant 9.99999997E-7 : f32
    %62 = vector.broadcast %cst_29 : f32 to vector<16x1xf32>
    %63 = arith.addf %61, %62 : vector<16x1xf32>
    %64 = tpu.reciprocal %63 {approx = true} : vector<16x1xf32> -> vector<16x1xf32>
    %65 = vector.broadcast %51 : vector<16x1xf32> to vector<16x32xf32>
    %66 = arith.subf %47, %65 : vector<16x32xf32>
    %67 = vector.broadcast %6 : vector<1x32xf32> to vector<16x32xf32>
    %68 = vector.broadcast %64 : vector<16x1xf32> to vector<16x32xf32>
    %69 = arith.mulf %67, %68 : vector<16x32xf32>
    %70 = arith.mulf %66, %69 : vector<16x32xf32>
    %71 = vector.broadcast %7 : vector<1x32xf32> to vector<16x32xf32>
    %72 = arith.addf %70, %71 : vector<16x32xf32>
    %73 = arith.truncf %72 : vector<16x32xf32> to vector<16x32xbf16>
    %c0_30 = arith.constant 0 : index
    %c0_31 = arith.constant 0 : index
    %74 = vector.load %arg9[%c0_30, %c0_31] : memref<32x128xbf16, #tpu.memory_space<vmem>>, vector<32x128xbf16>
    %cst_32 = arith.constant dense<0.000000e+00> : vector<16x128xf32>
    %75 = tpu.matmul %73, %74, %cst_32 {dimension_numbers = #tpu.dot_dimension_numbers<[1], [0], [0], [1], [0, 0, 1, 1], [], []>} : vector<16x32xbf16>, vector<32x128xbf16>, vector<16x128xf32> -> vector<16x128xf32>
    %c0_33 = arith.constant 0 : index
    %c0_34 = arith.constant 0 : index
    %76 = vector.load %arg12[%c0_33, %c0_34] : memref<1x128xf32, #tpu.memory_space<vmem>>, vector<1x128xf32>
    %77 = vector.broadcast %76 : vector<1x128xf32> to vector<16x128xf32>
    %78 = arith.addf %75, %77 : vector<16x128xf32>
    %cst_35 = arith.constant 0.000000e+00 : f32
    %79 = vector.broadcast %cst_35 : f32 to vector<16x128xf32>
    %80 = arith.maximumf %78, %79 : vector<16x128xf32>
    %81 = arith.truncf %80 : vector<16x128xf32> to vector<16x128xbf16>
    %c0_36 = arith.constant 0 : index
    %c0_37 = arith.constant 0 : index
    %82 = vector.load %arg10[%c0_36, %c0_37] : memref<128x32xbf16, #tpu.memory_space<vmem>>, vector<128x32xbf16>
    %cst_38 = arith.constant dense<0.000000e+00> : vector<16x32xf32>
    %83 = tpu.matmul %81, %82, %cst_38 {dimension_numbers = #tpu.dot_dimension_numbers<[1], [0], [0], [1], [0, 0, 1, 1], [], []>} : vector<16x128xbf16>, vector<128x32xbf16>, vector<16x32xf32> -> vector<16x32xf32>
    %84 = vector.broadcast %5 : vector<1x32xf32> to vector<16x32xf32>
    %85 = arith.addf %83, %84 : vector<16x32xf32>
    %86 = arith.addf %72, %85 : vector<16x32xf32>
    %cst_39 = arith.constant dense<0.000000e+00> : vector<16xf32>
    %87 = vector.multi_reduction <add>, %86, %cst_39 [1] : vector<16x32xf32> to vector<16xf32>
    %88 = vector.shape_cast %87 : vector<16xf32> to vector<16x1xf32>
    %cst_40 = arith.constant 3.200000e+01 : f32
    %89 = vector.broadcast %cst_40 : f32 to vector<16x1xf32>
    %90 = arith.divf %88, %89 : vector<16x1xf32>
    %91 = vector.broadcast %90 : vector<16x1xf32> to vector<16x32xf32>
    %92 = arith.subf %86, %91 : vector<16x32xf32>
    %93 = arith.mulf %92, %92 : vector<16x32xf32>
    %cst_41 = arith.constant dense<0.000000e+00> : vector<16xf32>
    %94 = vector.multi_reduction <add>, %93, %cst_41 [1] : vector<16x32xf32> to vector<16xf32>
    %95 = vector.shape_cast %94 : vector<16xf32> to vector<16x1xf32>
    %cst_42 = arith.constant 0.0322580636 : f32
    %96 = vector.broadcast %cst_42 : f32 to vector<16x1xf32>
    %97 = arith.mulf %95, %96 : vector<16x1xf32>
    %cst_43 = arith.constant 9.99999997E-7 : f32
    %98 = vector.broadcast %cst_43 : f32 to vector<16x1xf32>
    %99 = arith.addf %97, %98 : vector<16x1xf32>
    %100 = math.sqrt %99 : vector<16x1xf32>
    %cst_44 = arith.constant 9.99999997E-7 : f32
    %101 = vector.broadcast %cst_44 : f32 to vector<16x1xf32>
    %102 = arith.addf %100, %101 : vector<16x1xf32>
    %103 = tpu.reciprocal %102 {approx = true} : vector<16x1xf32> -> vector<16x1xf32>
    %104 = vector.broadcast %90 : vector<16x1xf32> to vector<16x32xf32>
    %105 = arith.subf %86, %104 : vector<16x32xf32>
    %106 = vector.broadcast %8 : vector<1x32xf32> to vector<16x32xf32>
    %107 = vector.broadcast %103 : vector<16x1xf32> to vector<16x32xf32>
    %108 = arith.mulf %106, %107 : vector<16x32xf32>
    %109 = arith.mulf %105, %108 : vector<16x32xf32>
    %110 = vector.broadcast %9 : vector<1x32xf32> to vector<16x32xf32>
    %111 = arith.addf %109, %110 : vector<16x32xf32>
    %c0_45 = arith.constant 0 : index
    %c0_46 = arith.constant 0 : index
    %112 = vector.load %arg4[%c0_45, %c0_46] : memref<16x1xf32, #tpu.memory_space<vmem>>, vector<16x1xf32>
    %113 = vector.broadcast %112 : vector<16x1xf32> to vector<16x32xf32>
    %114 = arith.mulf %111, %113 : vector<16x32xf32>
    %c0_47 = arith.constant 0 : index
    %c0_48 = arith.constant 0 : index
    %115 = vector.load %arg13[%c0_47, %c0_48] : memref<16x32xf32, #tpu.memory_space<vmem>>, vector<16x32xf32>
    tpu.vector_store %arg13[%c0_47, %c0_48], %114 {strides = array<i32>} : memref<16x32xf32, #tpu.memory_space<vmem>>, vector<16x32xf32>,
    return
  }
  func.func @transform_0(%arg0: i32) -> (i32, i32) {
    %c0_i32 = arith.constant 0 : i32
    %c0_i32_0 = arith.constant 0 : i32
    return %arg0, %c0_i32 : i32, i32
  }
  func.func @transform_1(%arg0: i32) -> (i32, i32, i32) {
    %c0_i32 = arith.constant 0 : i32
    %c0_i32_0 = arith.constant 0 : i32
    %c0_i32_1 = arith.constant 0 : i32
    return %arg0, %c0_i32, %c0_i32_0 : i32, i32, i32
  }
  func.func @transform_2(%arg0: i32) -> (i32, i32, i32) {
    %c0_i32 = arith.constant 0 : i32
    %c0_i32_0 = arith.constant 0 : i32
    %c0_i32_1 = arith.constant 0 : i32
    return %arg0, %c0_i32, %c0_i32_0 : i32, i32, i32
  }
  func.func @transform_3(%arg0: i32) -> (i32, i32) {
    %c0_i32 = arith.constant 0 : i32
    %c0_i32_0 = arith.constant 0 : i32
    return %arg0, %c0_i32 : i32, i32
  }
  func.func @transform_4(%arg0: i32) -> (i32, i32) {
    %c0_i32 = arith.constant 0 : i32
    %c0_i32_0 = arith.constant 0 : i32
    %c0_i32_1 = arith.constant 0 : i32
    return %c0_i32, %c0_i32_0 : i32, i32
  }
  func.func @transform_5(%arg0: i32) -> (i32, i32) {
    %c0_i32 = arith.constant 0 : i32
    %c0_i32_0 = arith.constant 0 : i32
    %c0_i32_1 = arith.constant 0 : i32
    return %c0_i32, %c0_i32_0 : i32, i32
  }
  func.func @transform_6(%arg0: i32) -> (i32, i32) {
    %c0_i32 = arith.constant 0 : i32
    %c0_i32_0 = arith.constant 0 : i32
    %c0_i32_1 = arith.constant 0 : i32
    return %c0_i32, %c0_i32_0 : i32, i32
  }
  func.func @transform_7(%arg0: i32) -> (i32, i32) {
    %c0_i32 = arith.constant 0 : i32
    %c0_i32_0 = arith.constant 0 : i32
    %c0_i32_1 = arith.constant 0 : i32
    return %c0_i32, %c0_i32_0 : i32, i32
  }
  func.func @transform_8(%arg0: i32) -> (i32, i32) {
    %c0_i32 = arith.constant 0 : i32
    %c0_i32_0 = arith.constant 0 : i32
    %c0_i32_1 = arith.constant 0 : i32
    return %c0_i32, %c0_i32_0 : i32, i32
  }
  func.func @transform_9(%arg0: i32) -> (i32, i32) {
    %c0_i32 = arith.constant 0 : i32
    %c0_i32_0 = arith.constant 0 : i32
    %c0_i32_1 = arith.constant 0 : i32
    return %c0_i32, %c0_i32_0 : i32, i32
  }
  func.func @transform_10(%arg0: i32) -> (i32, i32) {
    %c0_i32 = arith.constant 0 : i32
    %c0_i32_0 = arith.constant 0 : i32
    %c0_i32_1 = arith.constant 0 : i32
    return %c0_i32, %c0_i32_0 : i32, i32
  }
  func.func @transform_11(%arg0: i32) -> (i32, i32) {
    %c0_i32 = arith.constant 0 : i32
    %c0_i32_0 = arith.constant 0 : i32
    %c0_i32_1 = arith.constant 0 : i32
    return %c0_i32, %c0_i32_0 : i32, i32
  }
  func.func @transform_12(%arg0: i32) -> (i32, i32) {
    %c0_i32 = arith.constant 0 : i32
    %c0_i32_0 = arith.constant 0 : i32
    return %arg0, %c0_i32 : i32, i32
  }
}

</mosaic_0001>

<bundles_post_ra>
// kernel: tpu_custom_call.1
= control target key start
LH: loop header
LB: loop body
LE: loop exit
PB: predicated region body
PF: predicated region fallthrough
CT: control target
= control target key end

     0   :  { %s2695_s0 = inlined_call_operand.vmem [shape: f32[32,32], index: 0, kind: input, shape index: {}]   ;;  %s2696_s1 = inlined_call_operand.vmem [shape: bf16[32,8,64], index: 1, kind: input, shape index: {}]   ;;  %s2697_s2 = inlined_call_operand.vmem [shape: f32[32,8,1], index: 2, kind: input, shape index: {}]   ;;  %s2698_s3 = inlined_call_operand.vmem [shape: f32[32,1], index: 3, kind: input, shape index: {}]   ;;  %s2699_s4 = inlined_call_operand.vmem [shape: bf16[32,32], index: 4, kind: input, shape index: {}]   ;;  %s2700_s5 = inlined_call_operand.vmem [shape: bf16[64,32], index: 5, kind: input, shape index: {}]   ;;  %s2701_s6 = inlined_call_operand.vmem [shape: bf16[32,32], index: 6, kind: input, shape index: {}]   ;;  %s2702_s7 = inlined_call_operand.vmem [shape: bf16[32,32], index: 7, kind: input, shape index: {}]   ;;  %s2703_s8 = inlined_call_operand.vmem [shape: bf16[32,128], index: 8, kind: input, shape index: {}]   ;;  %s2704_s9 = inlined_call_operand.vmem [shape: bf16[128,32], index: 9, kind: input, shape index: {}]   ;;  %s2705_s10 = inlined_call_operand.vmem [shape: f32[8,32], index: 10, kind: input, shape index: {}]   ;;  %s2706_s11 = inlined_call_operand.vmem [shape: f32[1,128], index: 11, kind: input, shape index: {}]   ;;  %s2707_s12 = inlined_call_operand.hbm [shape: f32[32,32], index: 12, kind: output, shape index: {}]  }
   0x1   :  { %2708 = sst [smem:[#allocation6_spill]] %s2699_s4 }
   0x2   :  { %17 = vsyncpa [#allocation3], 0 }
   0x3   :  { %19 = vsyncpa [#allocation3 + $0x1], 0  ;;  %s2286_s21 = smov 0   ;;  %s2288_s22 = smov 0  }
   0x4   :  { %s2290_s23 = smov 0   ;;  %s2292_s24 = smov 0  }
   0x5 LB: > { %s1900_s25 = sadd.s32 4294967295, %s2215_s24   ;;  %s1901_s26 = sadd.s32 4294967294, %s2215_s24   ;;  %s2215_s24 = sphi %s2292_s24, %s2717_s24   ;;  %s2211_s23 = sphi %s2290_s23, %s2716_s23   ;;  %s2207_s22 = sphi %s2288_s22, %s2715_s22   ;;  %s2203_s21 = sphi %s2286_s21, %s2714_s21  }
   0x6   : > { %s2309_s27 = sadd.s32 1, %s2215_s24   ;;  %s304_s28 = sadd.s32 1, %s2211_s23 }
   0x7   : > { %s301_s29 = ssub.s32 %s2215_s24, %s2309_s27  ;;  %p314_p0 = scmp.ne.s32.totalorder %s2211_s23, %s2207_s22 }
   0x8   : > { %p302_p1 = scmp.eq.s32.totalorder %s301_s29, 0  ;;  %p315_p2 = scmp.eq.s32.totalorder %s1900_s25, 1 }
   0x9   : > { %p320_p3 = scmp.ne.s32.totalorder %s2207_s22, %s2203_s21  ;;  %p321_p4 = scmp.eq.s32.totalorder %s1901_s26, 1 }
   0xa   : > { %s2319_s30 = scalar_select %p302_p1, %s2211_s23, %s304_s28  }
   0xb   : > { %p2321_p5 = por %p315_p2, %p314_p0  ;;  %p2325_p6 = por %p321_p4, %p320_p3 }
   0xc   : > { %2709 = sst [smem:[#allocation5_spill]] %s2319_s30  ;;  %p1904_p7 = scmp.ge.s32.totalorder %s2215_s24, 1 }
   0xd   : > { %p399_p8 = scmp.lt.s32.totalorder %s2215_s24, 3 }
   0xf   : > { %p400_p9 = pnand %p1904_p7, %p399_p8 }
  0x10   : > { %s2712_s4 = sld [smem:[#allocation6_spill]] (!%p400_p9)  ;;  %s1906_s19 = sshll.u32 (!%p400_p9), %s1900_s25, 1 }
  0x11   : > { %403 = sbr.rel (%p400_p9) target bundleno = 1436 (0x59c), region = 68  ;;  %s2337_s20 = sshll.u32 (!%p400_p9), %s1900_s25, 4 }
  0x12   : > { %p457_p10 = scmp.lt.s32.totalorder (!%p400_p9), %s1906_s19, 3  ;;  %p463_p11 = scmp.lt.s32.totalorder (!%p400_p9), %s2337_s20, 31 }
  0x16   : > { %v2051_v0 = vld [vmem:[%s2712_s4 + $0x8] sm:$0xff]  ;;  %v2063_v1 = vld [vmem:[%s2700_s5 + $0x18] sm:$0xff]  ;;  %v2050_v2 = vld [vmem:[%s2712_s4] sm:$0xff]  ;;  %s2719_s19 = smov (!%p457_p10, %s1906_s19), 3  ;;  %vm503_vm0 = vcmask 261120   ;;  %vm738_vm1 = vcmask 523264  }
  0x17   : > { %513 = vmatpush.bf16.msra.mxu0 %v2051_v0  ;;  %2079 = vmatpush.bf16.msra.mxu1 %v2063_v1  ;;  %v2062_v3 = vld [vmem:[%s2700_s5 + $0x10] sm:$0xff]  ;;  %s2349_s25 = scalar_select %p463_p11, %s2337_s20, 31  ;;  %v2061_v4 = vld [vmem:[%s2700_s5 + $0x8] sm:$0xff]  ;;  %v2060_v8 = vld [vmem:[%s2700_s5] sm:$0xff]  ;;  %v2217_v18 = vmov 0   ;;  %vm537_vm2 = vcmask 7168  }
  0x18   : > { %s1907_s16 = sshll.u32 %s2719_s19, 3  ;;  %v2065_v17 = vld [vmem:[%s2701_s6 + $0x8] sm:$0xff]  ;;  %2128 = vset.pattern.permute.xlu0 %v2217_v18  ;;  %2129 = vset.pattern.permute.xlu1 %v2217_v18  ;;  %v2064_v21 = vld [vmem:[%s2701_s6] sm:$0xff]  ;;  %vm1427_vm3 = vcmask 1041409   ;;  %vm1429_vm4 = vcmask 1042434   ;;  %vm1431_vm5 = vcmask 1043459  }
  0x19   : > { %s2357_s26 = scalar_lea.vmem %s2695_s0, %s1907_s16  ;;  %s1909_s29 = sshll.u32 %s2349_s25, 2  ;;  %994 = vmatpush.bf16.msra.mxu2 %v2065_v17  ;;  %2130 = vset.pattern.permute.xlu2 %v2217_v18  ;;  %v2401_v24 = vld [vmem:[%s2705_s10] sm:$0xff]  ;;  %vm1433_vm6 = vcmask 1044484   ;;  %vm1435_vm7 = vcmask 1045509   ;;  %vm1437_vm8 = vcmask 1046534   ;;  %vm1439_vm9 = vcmask 1047559  }
  0x1a   : > { %v482_v5 = vld [vmem:[%s2357_s26] sm:$0xff]  ;;  %v483_v6 = vld [vmem:[%s2357_s26 + $0x8] sm:$0xff]  ;;  %s466_s4 = scalar_lea.vmem %s2696_s1, %s1909_s29  ;;  %s1911_s30 = sshll.u32 %s2349_s25, 3  ;;  %2083 = vmatpush.bf16.msra.mxu3 %v2065_v17  ;;  %v490_v28 = vperm.slane %v2401_v24, 0 }
  0x1b   : > { %514 = vmatpush.bf16.msra.mxu0 %v2050_v2  ;;  %2080 = vmatpush.bf16.msra.mxu1 %v2062_v3  ;;  %v485_v7 = vpack.c.bf16 %v483_v6, %v482_v5  ;;  %v2055_v9 = vld [vmem:[%s466_s4 + $0x18] sm:$0xff]  ;;  %v2052_v10 = vld [vmem:[%s466_s4] sm:$0xff]  ;;  %v2053_v12 = vld [vmem:[%s466_s4 + $0x8] sm:$0xff]  ;;  %s2384_s15 = scalar_lea.vmem %s2697_s2, %s1911_s30  ;;  %s478_s18 = scalar_lea.vmem %s2698_s3, %s1907_s16 }
  0x1c   : > { %v2056_v11 = vld [vmem:[%s466_s4 + $0x20] sm:$0xff]  ;;  %v2057_v13 = vld [vmem:[%s466_s4 + $0x28] sm:$0xff]  ;;  %v2054_v14 = vld [vmem:[%s466_s4 + $0x10] sm:$0xff]  ;;  %s453_s19 = sand.u32 1, %s2207_s22   ;;  %s1799_s30 = scalar_lea.hbm %s2707_s12, %s2337_s20 }
  0x1d   : > { %v2058_v15 = vld [vmem:[%s466_s4 + $0x30] sm:$0xff]  ;;  %v2059_v16 = vld [vmem:[%s466_s4 + $0x38] sm:$0xff]  ;;  %v2390_v19 = vld [vmem:[%s2384_s15] sm:$0xff]  ;;  %995 = vmatpush.bf16.msra.mxu2 %v2064_v21  ;;  %s1905_s16 = sshll.u32 %s453_s19, 4  ;;  %s1802_s29 = sshll.u32 %s1799_s30, 4  ;;  %s1803_s29 = int_to_ptr.hbm [resolvable:$true] %s1802_s29 }
  0x1e   : > { %1922 = vmatmul.msk.bf16.vlgmr.msra.gmra.mxu0 %vm503_vm0, %v485_v7  ;;  %1072 = vperm.xlu0 %2128, %v2390_v19   ;;  %v529_v20 = vld [vmem:[%s2384_s15 + $0x40] sm:$0xff]  ;;  %v522_v23 = vld [vmem:[%s2384_s15 + $0x8] sm:$0xff]  ;;  %v524_v29 = vld [vmem:[%s2384_s15 + $0x18] sm:$0xff]  ;;  %s455_s25 = scalar_lea.vmem [#allocation2], %s1905_s16  ;;  %s2167_s17 = sshra.s32 %s1803_s29, 4  ;;  %s2168_s17 = int_to_ptr.hbm [resolvable:$true] %s2167_s17 }
  0x1f   : > { %767 = vmatpush.bf16.msrb.mxu0 %v2063_v1  ;;  %2081 = vmatpush.bf16.msra.mxu1 %v2061_v4  ;;  %v2404_v25 = vld [vmem:[%s2384_s15 + $0x48] sm:$0xff]  ;;  %v2418_v31 = vld [vmem:[%s2384_s15 + $0x58] sm:$0xff]  ;;  %v545_v37 = vsel %vm537_vm2, %v522_v23, 0.0  ;;  %v533_v38 = vld [vmem:[%s2384_s15 + $0x60] sm:$0xff]  ;;  %v594_v63 = vsel %vm537_vm2, %v529_v20, 0.0  ;;  %s1800_s28 = sshll.u32 %s455_s25, 4  ;;  %p2174_p1 = scmp.lt.s32.totalorder %s2168_s17, %s2707_s12  ;;  %s1801_s28 = int_to_ptr.vmem [resolvable:$true] %s1800_s28 }
  0x20   : > { %1112 = vperm.xlu1 %2129, %v529_v20   ;;  %2084 = vmatpush.bf16.msra.mxu3 %v2064_v21  ;;  %v546_v39 = vrot.slane %v545_v37, 4  ;;  %v2430_v43 = vld [vmem:[%s2384_s15 + $0x28] sm:$0xff]  ;;  %v527_v55 = vld [vmem:[%s2384_s15 + $0x30] sm:$0xff]  ;;  %v595_v6 = vrot.slane %v594_v63, 4  ;;  %s2173_s4 = scalar_lea.hbm %s2707_s12, 32 }
  0x21   : > { %v523_v56 = vld [vmem:[%s2384_s15 + $0x10] sm:$0xff] }
  0x22   : > { %v547_v46 = vadd.f32 %v546_v39, %v545_v37  ;;  %v2439_v57 = vld [vmem:[%s2384_s15 + $0x70] sm:$0xff]  ;;  %1082 = vperm.xlu2 %2130, %v523_v56   ;;  %v552_v59 = vsel %vm537_vm2, %v523_v56, 0.0  ;;  %v596_v20 = vadd.f32 %v595_v6, %v594_v63 }
  0x23   : > { %768 = vmatpush.bf16.msrb.mxu0 %v2062_v3  ;;  %2082 = vmatpush.bf16.msra.mxu1 %v2060_v8  ;;  %v553_v62 = vrot.slane %v552_v59, 4  ;;  %v559_v3 = vsel %vm537_vm2, %v524_v29, 0.0  ;;  %v531_v5 = vld [vmem:[%s2384_s15 + $0x50] sm:$0xff] }
  0x24   : > { %v548_v51 = vrot.slane %v547_v46, 2 }
  0x26   : > { %1974 = vmatmul.msk.bf16.vlgmr.msra.gmra.mxu1 %vm738_vm1, %v2055_v9  ;;  %1077 = vperm.xlu0 %2128, %v522_v23   ;;  %v549_v0 = vadd.f32 %v548_v51, %v547_v46  ;;  %v560_v9 = vrot.slane %v559_v3, 4 }
  0x27   : > { %769 = vmatpush.bf16.msrb.mxu0 %v2061_v4  ;;  %v554_v4 = vadd.f32 %v553_v62, %v552_v59 }
  0x28   : > { %1117 = vperm.xlu1 %2129, %v2404_v25  }
  0x29   : > { %v555_v7 = vrot.slane %v554_v4, 2 }
  0x2a   : > { %1122 = vperm.xlu2 %2130, %v531_v5  }
  0x2b   : > { %770 = vmatpush.bf16.msrb.mxu0 %v2060_v8  ;;  %v608_v8 = vsel %vm537_vm2, %v531_v5, 0.0 }
  0x2e   : > { %1971 = vmatmul.msk.bf16.vlgmr.msrb.gmra.mxu0 %vm738_vm1, %v2052_v10  ;;  %1087 = vperm.xlu0 %2128, %v524_v29   ;;  %v2450_v10 = vld [vmem:[%s2384_s15 + $0x78] sm:$0xff]  ;;  %v601_v29 = vsel %vm537_vm2, %v2404_v25, 0.0  ;;  %v580_v25 = vsel %vm537_vm2, %v527_v55, 0.0 }
  0x30   : > { %1127 = vperm.xlu1 %2129, %v2418_v31  }
  0x36   : > { %1975 = vmatmul.msk.bf16.gmra.mxu1 %vm738_vm1, %v2056_v11  ;;  %1132 = vperm.xlu0 %2128, %v533_v38   ;;  %v609_v11 = vrot.slane %v608_v8, 4 }
  0x38   : > { %1097 = vperm.xlu1 %2129, %v2430_v43   ;;  %v610_v18 = vadd.f32 %v609_v11, %v608_v8 }
  0x3e   : > { %1972 = vmatmul.msk.bf16.gmra.mxu0 %vm738_vm1, %v2053_v12  ;;  %1102 = vperm.xlu0 %2128, %v527_v55   ;;  %v550_v12 = vrot.slane %v549_v0, 1 }
  0x40   : > { %1142 = vperm.xlu1 %2129, %v2439_v57   ;;  %v551_v23 = vadd.f32 %v550_v12, %v549_v0 }
  0x46   : > { %1976 = vmatmul.msk.bf16.gmra.mxu1 %vm738_vm1, %v2057_v13  ;;  %1147 = vperm.xlu0 %2128, %v2450_v10  }
  0x48   : > { %1305 = vperm.xlu1 %2129, %v551_v23  }
  0x4e   : > { %1973 = vmatmul.msk.bf16.gmra.mxu0 %vm738_vm1, %v2054_v14 }
  0x56   : > { %1977 = vmatmul.msk.bf16.gmra.mxu1 %vm738_vm1, %v2058_v15 }
  0x66   : > { %1978 = vmatmul.msk.bf16.gmra.mxu1 %vm738_vm1, %v2059_v16  ;;  %v622_v16 = vsel %vm537_vm2, %v533_v38, 0.0  ;;  %v538_v38 = vsel %vm537_vm2, %v2390_v19, 0.0 }
  0x67   : > { %v539_v59 = vrot.slane %v538_v38, 4 }
  0x69   : > { %v2476_v11 = vadd.f32 %v539_v59, %v538_v38  ;;  %v615_v59 = vsel %vm537_vm2, %v2418_v31, 0.0 }
  0x9b   : > { %v516_v22 = vpop.f32.mrf.mxu0 }
  0x9c   : > { %v2415_v30 = vadd.f32 %v516_v22, %v490_v28  ;;  %v556_v22 = vadd.f32 %v555_v7, %v554_v4 }
  0x9e   : > { %v828_v34 = vperm.slane %v2415_v30, 0  ;;  %v814_v36 = vrot.slane %v2415_v30, 1  ;;  %v815_v50 = vrot.slane %v2415_v30, 2  ;;  %v816_v2 = vrot.slane %v2415_v30, 3 }
  0x9f   : > { %v817_v39 = vrot.slane %v2415_v30, 4  ;;  %v557_v46 = vrot.slane %v556_v22, 1  ;;  %v818_v0 = vrot.slane %v2415_v30, 5 }
  0xa0   : > { %v829_v41 = vperm.slane %v814_v36, 0  ;;  %v830_v60 = vperm.slane %v815_v50, 0  ;;  %v831_v14 = vperm.slane %v816_v2, 0 }
  0xa1   : > { %v558_v56 = vadd.f32 %v557_v46, %v556_v22  ;;  %v832_v55 = vperm.slane %v817_v39, 0  ;;  %v833_v12 = vperm.slane %v818_v0, 0 }
  0xa3   : > { %v2406_v26 = vpop.f32.mrf.mxu1  ;;  %v2409_v27 = vpop.f32.mrf.mxu0  ;;  %1310 = vperm.xlu0 %2128, %v558_v56  }
  0xab   : > { %v2420_v32 = vpop.f32.mrf.mxu1  ;;  %v772_v33 = vpop.f32.mrf.mxu0 }
  0xac   : > { %v860_v35 = vadd.f32 %v828_v34, %v772_v33  ;;  %v561_v33 = vadd.f32 %v560_v9, %v559_v3  ;;  %v623_v34 = vrot.slane %v622_v16, 4  ;;  %v820_v9 = vrot.slane %v2415_v30, 7 }
  0xae   : > { %v876_v40 = vmax.f32 %v860_v35, 0.0  ;;  %v611_v35 = vrot.slane %v610_v18, 2 }
  0xb0   : > { %v892_v47 = vpack.c.bf16 %v876_v40, %v876_v40  ;;  %v612_v40 = vadd.f32 %v611_v35, %v610_v18  ;;  %v534_v18 = vld [vmem:[%s2384_s15 + $0x68] sm:$0xff] }
  0xb2   : > { %v928_v52 = vunpack.c.l.b16 %v892_v47  ;;  %v562_v47 = vrot.slane %v561_v33, 2  ;;  %v613_v50 = vrot.slane %v612_v40, 1 }
  0xb3   : > { %v2427_v42 = vpop.f32.mrf.mxu1  ;;  %v774_v44 = vpop.f32.mrf.mxu0 }
  0xb4   : > { %v861_v45 = vadd.f32 %v829_v41, %v774_v44  ;;  %v597_v41 = vrot.slane %v596_v20, 2  ;;  %v602_v44 = vrot.slane %v601_v29, 4  ;;  %v614_v62 = vadd.f32 %v613_v50, %v612_v40 }
  0xb5   : > { %v563_v4 = vadd.f32 %v562_v47, %v561_v33  ;;  %v629_v33 = vsel %vm537_vm2, %v534_v18, 0.0 }
  0xb6   : > { %v877_v48 = vmax.f32 %v861_v45, 0.0  ;;  %v598_v2 = vadd.f32 %v597_v41, %v596_v20  ;;  %v603_v3 = vadd.f32 %v602_v44, %v601_v29  ;;  %1350 = vperm.xlu1 %2129, %v614_v62   ;;  %v643_v29 = vsel %vm537_vm2, %v2450_v10, 0.0  ;;  %v528_v10 = vld [vmem:[%s2384_s15 + $0x38] sm:$0xff] }
  0xb8   : > { %v893_v49 = vpack.c.bf16 %v877_v48, %v877_v48  ;;  %v624_v48 = vadd.f32 %v623_v34, %v622_v16  ;;  %v599_v20 = vrot.slane %v598_v2, 1 }
  0xba   : > { %v929_v53 = vunpack.c.l.b16 %v893_v49  ;;  %v525_v49 = vld [vmem:[%s2384_s15 + $0x20] sm:$0xff]  ;;  %s1788_s15 = scalar_lea.sflag [#allocation3], %s453_s19 }
  0xbb   : > { %v2434_v54 = vpop.f32.mrf.mxu1  ;;  %v777_v58 = vpop.f32.mrf.mxu0  ;;  %v566_v19 = vsel %vm537_vm2, %v525_v49, 0.0  ;;  %1092 = vperm.xlu2 %2130, %v525_v49   ;;  %v587_v49 = vsel %vm537_vm2, %v528_v10, 0.0 }
  0xbc   : > { %v944_v61 = vpack.c.b16 %v929_v53, %v928_v52  ;;  %v862_v1 = vadd.f32 %v830_v60, %v777_v58  ;;  %v2469_v58 = vadd.f32 %v2409_v27, %v490_v28  ;;  %v625_v27 = vrot.slane %v624_v48, 2 }
  0xbd   : > { %v819_v28 = vrot.slane %v2415_v30, 6 }
  0xbe   : > { %1987 = vmatmul.msk.bf16.vlgmr.msra.gmra.mxu2 %vm503_vm0, %v944_v61  ;;  %v878_v13 = vmax.f32 %v862_v1, 0.0  ;;  %v567_v61 = vrot.slane %v566_v19, 4  ;;  %v581_v1 = vrot.slane %v580_v25, 4  ;;  %v824_v7 = vrot.slane %v2469_v58, 4 }
  0xbf   : > { %v626_v22 = vadd.f32 %v625_v27, %v624_v48  ;;  %v834_v38 = vperm.slane %v819_v28, 0  ;;  %v825_v41 = vrot.slane %v2469_v58, 5  ;;  %v541_v28 = vrot.slane %v2476_v11, 2 }
  0xc0   : > { %v894_v36 = vpack.c.bf16 %v878_v13, %v878_v13  ;;  %v568_v5 = vadd.f32 %v567_v61, %v566_v19  ;;  %v582_v13 = vadd.f32 %v581_v1, %v580_v25  ;;  %v840_v30 = vperm.slane %v824_v7, 0 }
  0xc1   : > { %v627_v50 = vrot.slane %v626_v22, 1  ;;  %v588_v19 = vrot.slane %v587_v49, 4  ;;  %v841_v62 = vperm.slane %v825_v41, 0  ;;  %v866_v7 = vadd.f32 %v834_v38, %v2406_v26 }
  0xc2   : > { %v930_v51 = vunpack.c.l.b16 %v894_v36  ;;  %v569_v8 = vrot.slane %v568_v5, 2  ;;  %v630_v36 = vrot.slane %v629_v33, 4  ;;  %v583_v40 = vrot.slane %v582_v13, 2 }
  0xc3   : > { %v2452_v15 = vpop.f32.mrf.mxu1  ;;  %v779_v17 = vpop.f32.mrf.mxu0  ;;  %1137 = vperm.xlu2 %2130, %v534_v18   ;;  %v589_v1 = vadd.f32 %v588_v19, %v587_v49  ;;  %v628_v27 = vadd.f32 %v627_v50, %v626_v22  ;;  %v826_v26 = vrot.slane %v2469_v58, 6  ;;  %v636_v19 = vsel %vm537_vm2, %v2439_v57, 0.0 }
  0xc4   : > { %v863_v21 = vadd.f32 %v831_v14, %v779_v17  ;;  %v604_v14 = vrot.slane %v603_v3, 2  ;;  %v570_v16 = vadd.f32 %v569_v8, %v568_v5  ;;  %v564_v17 = vrot.slane %v563_v4, 1 }
  0xc5   : > { %v631_v46 = vadd.f32 %v630_v36, %v629_v33  ;;  %v584_v61 = vadd.f32 %v583_v40, %v582_v13  ;;  %v882_v36 = vmax.f32 %v866_v7, 0.0 }
  0xc6   : > { %v879_v37 = vmax.f32 %v863_v21, 0.0  ;;  %v565_v35 = vadd.f32 %v564_v17, %v563_v4  ;;  %v571_v47 = vrot.slane %v570_v16, 1 }
  0xc7   : > { %v632_v56 = vrot.slane %v631_v46, 2 }
  0xc8   : > { %v895_v45 = vpack.c.bf16 %v879_v37, %v879_v37  ;;  %v600_v37 = vadd.f32 %v599_v20, %v598_v2  ;;  %1315 = vperm.xlu0 %2128, %v565_v35   ;;  %v572_v0 = vadd.f32 %v571_v47, %v570_v16  ;;  %v585_v20 = vrot.slane %v584_v61, 1 }
  0xca   : > { %v931_v52 = vunpack.c.l.b16 %v895_v45  ;;  %v644_v45 = vrot.slane %v643_v29, 4  ;;  %1340 = vperm.xlu1 %2129, %v600_v37   ;;  %v586_v40 = vadd.f32 %v585_v20, %v584_v61 }
  0xcb   : > { %v2463_v53 = vpop.f32.mrf.mxu1  ;;  %v782_v60 = vpop.f32.mrf.mxu0  ;;  %1107 = vperm.xlu2 %2130, %v528_v10  }
  0xcc   : > { %v945_v63 = vpack.c.b16 %v931_v52, %v930_v51  ;;  %v864_v6 = vadd.f32 %v832_v55, %v782_v60  ;;  %v835_v51 = vperm.slane %v820_v9, 0  ;;  %v605_v52 = vadd.f32 %v604_v14, %v603_v3 }
  0xcd   : > { %v616_v9 = vrot.slane %v615_v59, 4  ;;  %v590_v14 = vrot.slane %v589_v1, 2 }
  0xce   : > { %1988 = vmatmul.msk.bf16.gmra.mxu2 %vm503_vm0, %v945_v63  ;;  %v880_v21 = vmax.f32 %v864_v6, 0.0  ;;  %v645_v63 = vadd.f32 %v644_v45, %v643_v29  ;;  %v633_v6 = vadd.f32 %v632_v56, %v631_v46  ;;  %v867_v31 = vadd.f32 %v835_v51, %v2420_v32 }
  0xcf   : > { %v606_v18 = vrot.slane %v605_v52, 1  ;;  %v573_v32 = vsel %vm537_vm2, %v2430_v43, 0.0  ;;  %v617_v37 = vadd.f32 %v616_v9, %v615_v59  ;;  %v827_v43 = vrot.slane %v2469_v58, 7 }
  0xd0   : > { %v896_v48 = vpack.c.bf16 %v880_v21, %v880_v21  ;;  %1320 = vperm.xlu0 %2128, %v572_v0   ;;  %v646_v16 = vrot.slane %v645_v63, 2  ;;  %v634_v17 = vrot.slane %v633_v6, 1  ;;  %v542_v21 = vadd.f32 %v541_v28, %v2476_v11 }
  0xd1   : > { %v607_v29 = vadd.f32 %v606_v18, %v605_v52  ;;  %v574_v41 = vrot.slane %v573_v32, 4  ;;  %v618_v49 = vrot.slane %v617_v37, 2 }
  0xd2   : > { %v932_v2 = vunpack.c.l.b16 %v896_v48  ;;  %1360 = vperm.xlu1 %2129, %v628_v27   ;;  %v635_v35 = vadd.f32 %v634_v17, %v633_v6  ;;  %v647_v38 = vadd.f32 %v646_v16, %v645_v63  ;;  %v543_v45 = vrot.slane %v542_v21, 1 }
  0xd3   : > { %v802_v23 = vpop.f32.mrf.mxu1  ;;  %v784_v34 = vpop.f32.mrf.mxu0  ;;  %1345 = vperm.xlu2 %2130, %v607_v29   ;;  %v898_v48 = vpack.c.bf16 %v882_v36, %v882_v36  ;;  %v575_v51 = vadd.f32 %v574_v41, %v573_v32  ;;  %v619_v63 = vadd.f32 %v618_v49, %v617_v37  ;;  %v836_v6 = vperm.slane %v2469_v58, 0 }
  0xd4   : > { %v865_v39 = vadd.f32 %v833_v12, %v784_v34  ;;  %v872_v44 = vadd.f32 %v840_v30, %v802_v23  ;;  %v883_v23 = vmax.f32 %v867_v31, 0.0  ;;  %v591_v30 = vadd.f32 %v590_v14, %v589_v1 }
  0xd5   : > { %v648_v50 = vrot.slane %v647_v38, 1  ;;  %v544_v52 = vadd.f32 %v543_v45, %v542_v21  ;;  %v868_v57 = vadd.f32 %v836_v6, %v2427_v42  ;;  %v620_v31 = vrot.slane %v619_v63, 1 }
  0xd6   : > { %v881_v25 = vmax.f32 %v865_v39, 0.0  ;;  %v888_v55 = vmax.f32 %v872_v44, 0.0  ;;  %v842_v44 = vperm.slane %v826_v26, 0  ;;  %v899_v46 = vpack.c.bf16 %v883_v23, %v883_v23 }
  0xd7   : > { %v592_v10 = vrot.slane %v591_v30, 1  ;;  %v649_v1 = vadd.f32 %v648_v50, %v647_v38  ;;  %v621_v14 = vadd.f32 %v620_v31, %v619_v63  ;;  %v884_v18 = vmax.f32 %v868_v57, 0.0 }
  0xd8   : > { %v897_v60 = vpack.c.bf16 %v881_v25, %v881_v25  ;;  %v904_v12 = vpack.c.bf16 %v888_v55, %v888_v55  ;;  %1365 = vperm.xlu0 %2128, %v635_v35   ;;  %v821_v25 = vrot.slane %v2469_v58, 1  ;;  %v935_v56 = vunpack.c.l.b16 %v899_v46 }
  0xd9   : > { %v593_v61 = vadd.f32 %v592_v10, %v591_v30  ;;  %v900_v42 = vpack.c.bf16 %v884_v18, %v884_v18  ;;  %v823_v26 = vrot.slane %v2469_v58, 3 }
  0xda   : > { %v933_v4 = vunpack.c.l.b16 %v897_v60  ;;  %v940_v33 = vunpack.c.l.b16 %v904_v12  ;;  %1330 = vperm.xlu1 %2129, %v586_v40   ;;  %v843_v60 = vperm.slane %v827_v43, 0  ;;  %v837_v55 = vperm.slane %v821_v25, 0 }
  0xdb   : > { %v804_v5 = vpop.f32.mrf.mxu1  ;;  %1300 = vperm.xlu2 %2130, %v544_v52   ;;  %v839_v30 = vperm.slane %v823_v26, 0  ;;  %v2512_v43 = vperm.slane %v2401_v24, 1 }
  0xdc   : > { %v873_v3 = vadd.f32 %v841_v62, %v804_v5  ;;  %v946_v8 = vpack.c.b16 %v933_v4, %v932_v2  ;;  %v934_v62 = vunpack.c.l.b16 %v898_v48  ;;  %v576_v2 = vrot.slane %v575_v51, 2 }
  0xdd   : > { %v637_v4 = vrot.slane %v636_v19, 4  ;;  %v869_v27 = vadd.f32 %v837_v55, %v2434_v54  ;;  %v871_v37 = vadd.f32 %v839_v30, %v2463_v53 }
  0xde   : > { %v889_v13 = vmax.f32 %v873_v3, 0.0  ;;  %1989 = vmatmul.msk.bf16.gmra.mxu2 %vm503_vm0, %v946_v8  ;;  %v947_v28 = vpack.c.b16 %v935_v56, %v934_v62  ;;  %v577_v8 = vadd.f32 %v576_v2, %v575_v51 }
  0xdf   : > { %v638_v9 = vadd.f32 %v637_v4, %v636_v19  ;;  %v887_v41 = vmax.f32 %v871_v37, 0.0  ;;  %v1113_v37 = vpop.permute.xlu1 %1112 }
  0xe0   : > { %v905_v22 = vpack.c.bf16 %v889_v13, %v889_v13  ;;  %1335 = vperm.xlu0 %2128, %v593_v61   ;;  %v885_v13 = vmax.f32 %v869_v27, 0.0  ;;  %v578_v21 = vrot.slane %v577_v8, 1 }
  0xe1   : > { %v639_v20 = vrot.slane %v638_v9, 2 }
  0xe2   : > { %v941_v34 = vunpack.c.l.b16 %v905_v22  ;;  %1375 = vperm.xlu1 %2129, %v649_v1   ;;  %v901_v22 = vpack.c.bf16 %v885_v13, %v885_v13  ;;  %v579_v32 = vadd.f32 %v578_v21, %v577_v8 }
  0xe3   : > { %v807_v39 = vpop.f32.mrf.mxu1  ;;  %1355 = vperm.xlu2 %2130, %v621_v14   ;;  %v640_v23 = vadd.f32 %v639_v20, %v638_v9 }
  0xe4   : > { %v950_v11 = vpack.c.b16 %v941_v34, %v940_v33  ;;  %v874_v47 = vadd.f32 %v842_v44, %v807_v39  ;;  %v937_v29 = vunpack.c.l.b16 %v901_v22  ;;  %v822_v33 = vrot.slane %v2469_v58, 2 }
  0xe5   : > { %v936_v34 = vunpack.c.l.b16 %v900_v42  ;;  %v641_v35 = vrot.slane %v640_v23, 1 }
  0xe6   : > { %1993 = vmatmul.msk.bf16.vlgmr.msra.gmra.mxu3 %vm503_vm0, %v950_v11  ;;  %v890_v59 = vmax.f32 %v874_v47, 0.0  ;;  %v838_v36 = vperm.slane %v822_v33, 0  ;;  %v903_v11 = vpack.c.bf16 %v887_v41, %v887_v41 }
  0xe7   : > { %v948_v38 = vpack.c.b16 %v937_v29, %v936_v34  ;;  %v642_v40 = vadd.f32 %v641_v35, %v640_v23 }
  0xe8   : > { %v906_v3 = vpack.c.bf16 %v890_v59, %v890_v59  ;;  %v870_v39 = vadd.f32 %v838_v36, %v2452_v15  ;;  %v939_v46 = vunpack.c.l.b16 %v903_v11  ;;  %v1073_v15 = vpop.permute.xlu0 %1072 }
  0xea   : > { %v942_v16 = vunpack.c.l.b16 %v906_v3  ;;  %v886_v44 = vmax.f32 %v870_v39, 0.0 }
  0xeb   : > { %v809_v0 = vpop.f32.mrf.mxu1  ;;  %1325 = vperm.xlu2 %2130, %v579_v32  }
  0xec   : > { %v875_v5 = vadd.f32 %v843_v60, %v809_v0  ;;  %v902_v45 = vpack.c.bf16 %v886_v44, %v886_v44 }
  0xee   : > { %v891_v7 = vmax.f32 %v875_v5, 0.0  ;;  %1990 = vmatmul.msk.bf16.gmra.mxu2 %vm503_vm0, %v947_v28  ;;  %v938_v58 = vunpack.c.l.b16 %v902_v45  ;;  %v1083_v5 = vpop.permute.xlu2 %1082 }
  0xf0   : > { %v907_v12 = vpack.c.bf16 %v891_v7, %v891_v7  ;;  %v949_v47 = vpack.c.b16 %v939_v46, %v938_v58  ;;  %v1078_v59 = vpop.permute.xlu0 %1077 }
  0xf2   : > { %v943_v17 = vunpack.c.l.b16 %v907_v12 }
  0xf3   : > { %1370 = vperm.xlu2 %2130, %v642_v40  }
  0xf4   : > { %v951_v54 = vpack.c.b16 %v943_v17, %v942_v16 }
  0xf6   : > { %1994 = vmatmul.msk.bf16.gmra.mxu3 %vm503_vm0, %v951_v54  ;;  %v2524_v58 = vpop.permute.xlu2 %1122 }
  0xf8   : > { %v1088_v17 = vpop.permute.xlu0 %1087 }
  0xfe   : > { %1991 = vmatmul.msk.bf16.gmra.mxu2 %vm503_vm0, %v948_v38 }
 0x10e   : > { %1992 = vmatmul.msk.bf16.gmra.mxu2 %vm503_vm0, %v949_v47 }
 0x141   : > { %v997_v53 = vpop.f32.mrf.mxu2 }
 0x142   : > { %v1038_v10 = vadd.f32 %v2512_v43, %v997_v53  ;;  %v1118_v53 = vpop.permute.xlu1 %1117 }
 0x144   : > { %v1054_v48 = vmax.f32 %v1038_v10, 0.0 }
 0x146   : > { %v1150_v25 = vmul.f32 %v1073_v15, %v1054_v48 }
 0x148   : > { %v1166_v49 = vsel %vm503_vm0, %v1150_v25, 0.0  ;;  %v1093_v25 = vpop.permute.xlu2 %1092 }
 0x149   : > { %v1167_v50 = vrot.slane %v1166_v49, 4  ;;  %v999_v51 = vpop.f32.mrf.mxu2 }
 0x14a   : > { %v1039_v52 = vadd.f32 %v2512_v43, %v999_v51  ;;  %v1133_v51 = vpop.permute.xlu0 %1132 }
 0x14b   : > { %v1168_v56 = vadd.f32 %v1167_v50, %v1166_v49  ;;  %v2529_v50 = vpop.permute.xlu1 %1127 }
 0x14c   : > { %v1055_v19 = vmax.f32 %v1039_v52, 0.0 }
 0x14d   : > { %v1169_v60 = vrot.slane %v1168_v56, 2 }
 0x14e   : > { %v1151_v61 = vmul.f32 %v1078_v59, %v1055_v19 }
 0x14f   : > { %v1170_v62 = vadd.f32 %v1169_v60, %v1168_v56 }
 0x150   : > { %v1173_v24 = vsel %vm503_vm0, %v1151_v61, 0.0  ;;  %v1138_v59 = vpop.permute.xlu2 %1137 }
 0x151   : > { %v1174_v55 = vrot.slane %v1173_v24, 4  ;;  %v1002_v63 = vpop.f32.mrf.mxu2  ;;  %v1171_v1 = vrot.slane %v1170_v62, 1 }
 0x152   : > { %v1040_v0 = vadd.f32 %v2512_v43, %v1002_v63 }
 0x153   : > { %v1175_v2 = vadd.f32 %v1174_v55, %v1173_v24  ;;  %v1172_v28 = vadd.f32 %v1171_v1, %v1170_v62  ;;  %v1098_v61 = vpop.permute.xlu1 %1097  ;;  %v1103_v55 = vpop.permute.xlu0 %1102 }
 0x154   : > { %v1056_v4 = vmax.f32 %v1040_v0, 0.0 }
 0x155   : > { %v1176_v6 = vrot.slane %v1175_v2, 2  ;;  %v1278_v12 = vpack.c.bf16 %v1172_v28, %v1172_v28 }
 0x156   : > { %v1152_v27 = vmul.f32 %v1083_v5, %v1056_v4 }
 0x157   : > { %v1177_v3 = vadd.f32 %v1176_v6, %v1175_v2  ;;  %v1411_v21 = vunpack.c.l.b16 %v1278_v12 }
 0x158   : > { %v1180_v7 = vsel %vm503_vm0, %v1152_v27, 0.0 }
 0x159   : > { %v1178_v57 = vrot.slane %v1177_v3, 1  ;;  %v1181_v31 = vrot.slane %v1180_v7, 4  ;;  %v1004_v8 = vpop.f32.mrf.mxu2 }
 0x15a   : > { %v1041_v9 = vadd.f32 %v2512_v43, %v1004_v8  ;;  %v2067_v8 = vld [vmem:[%s2702_s7 + $0x8] sm:$0xff] }
 0x15b   : > { %v1179_v13 = vadd.f32 %v1178_v57, %v1177_v3  ;;  %v1182_v14 = vadd.f32 %v1181_v31, %v1180_v7  ;;  %1516 = vmatpush.bf16.msrb.mxu3 %v2067_v8 }
 0x15c   : > { %v1057_v16 = vmax.f32 %v1041_v9, 0.0 }
 0x15d   : > { %v1279_v18 = vpack.c.bf16 %v1179_v13, %v1179_v13  ;;  %v1183_v20 = vrot.slane %v1182_v14, 2 }
 0x15e   : > { %v1153_v54 = vmul.f32 %v1088_v17, %v1057_v16 }
 0x15f   : > { %v1412_v22 = vunpack.c.l.b16 %v1279_v18  ;;  %v1184_v42 = vadd.f32 %v1183_v20, %v1182_v14 }
 0x160   : > { %v1187_v26 = vsel %vm503_vm0, %v1153_v54, 0.0 }
 0x161   : > { %v1185_v23 = vrot.slane %v1184_v42, 1  ;;  %v1188_v32 = vrot.slane %v1187_v26, 4  ;;  %v1007_v29 = vpop.f32.mrf.mxu2  ;;  %v1428_v33 = vsel %vm1427_vm3, %v1412_v22, %v1411_v21  ;;  %v1108_v21 = vpop.permute.xlu2 %1107 }
 0x162   : > { %v1042_v60 = vadd.f32 %v2512_v43, %v1007_v29 }
 0x163   : > { %v1186_v34 = vadd.f32 %v1185_v23, %v1184_v42  ;;  %v1189_v30 = vadd.f32 %v1188_v32, %v1187_v26  ;;  %v1143_v26 = vpop.permute.xlu1 %1142 }
 0x164   : > { %v1058_v5 = vmax.f32 %v1042_v60, 0.0 }
 0x165   : > { %v1280_v35 = vpack.c.bf16 %v1186_v34, %v1186_v34  ;;  %v1190_v36 = vrot.slane %v1189_v30, 2 }
 0x166   : > { %v1154_v14 = vmul.f32 %v1093_v25, %v1058_v5 }
 0x167   : > { %v1413_v38 = vunpack.c.l.b16 %v1280_v35  ;;  %v1191_v39 = vadd.f32 %v1190_v36, %v1189_v30 }
 0x168   : > { %v1194_v34 = vsel %vm503_vm0, %v1154_v14, 0.0 }
 0x169   : > { %v1027_v40 = vpop.f32.mrf.mxu3  ;;  %v1192_v41 = vrot.slane %v1191_v39, 1  ;;  %v1430_v44 = vsel %vm1429_vm4, %v1413_v38, %v1428_v33  ;;  %v1009_v11 = vpop.f32.mrf.mxu2 }
 0x16a   : > { %v1043_v62 = vadd.f32 %v2512_v43, %v1009_v11  ;;  %v1050_v24 = vadd.f32 %v2512_v43, %v1027_v40  ;;  %v1148_v33 = vpop.permute.xlu0 %1147 }
 0x16b   : > { %v1193_v45 = vadd.f32 %v1192_v41, %v1191_v39 }
 0x16c   : > { %v1059_v27 = vmax.f32 %v1043_v62, 0.0  ;;  %v1066_v28 = vmax.f32 %v1050_v24, 0.0 }
 0x16d   : > { %v1281_v46 = vpack.c.bf16 %v1193_v45, %v1193_v45  ;;  %v2066_v45 = vld [vmem:[%s2702_s7] sm:$0xff] }
 0x16e   : > { %v1155_v17 = vmul.f32 %v1098_v61, %v1059_v27  ;;  %v1162_v18 = vmul.f32 %v1133_v51, %v1066_v28  ;;  %1517 = vmatpush.bf16.msrb.mxu3 %v2066_v45 }
 0x16f   : > { %v1414_v47 = vunpack.c.l.b16 %v1281_v46  ;;  %v1195_v46 = vrot.slane %v1194_v34, 4 }
 0x170   : > { %v1201_v35 = vsel %vm503_vm0, %v1155_v17, 0.0  ;;  %v1250_v36 = vsel %vm503_vm0, %v1162_v18, 0.0 }
 0x171   : > { %v2527_v10 = vsel %vm1431_vm5, %v1414_v47, %v1430_v44  ;;  %v1012_v15 = vpop.f32.mrf.mxu2  ;;  %v1029_v48 = vpop.f32.mrf.mxu3  ;;  %v1196_v61 = vadd.f32 %v1195_v46, %v1194_v34 }
 0x172   : > { %v1044_v63 = vadd.f32 %v2512_v43, %v1012_v15  ;;  %v1051_v0 = vadd.f32 %v2512_v43, %v1029_v48  ;;  %v1202_v15 = vrot.slane %v1201_v35, 4  ;;  %v1251_v48 = vrot.slane %v1250_v36, 4 }
 0x174   : > { %v1060_v7 = vmax.f32 %v1044_v63, 0.0  ;;  %v1067_v57 = vmax.f32 %v1051_v0, 0.0 }
 0x176   : > { %v1156_v22 = vmul.f32 %v1103_v55, %v1060_v7  ;;  %v1163_v42 = vmul.f32 %v1138_v59, %v1067_v57  ;;  %v1203_v55 = vadd.f32 %v1202_v15, %v1201_v35  ;;  %v1197_v7 = vrot.slane %v1196_v61, 2 }
 0x178   : > { %v1208_v39 = vsel %vm503_vm0, %v1156_v22, 0.0  ;;  %v1257_v40 = vsel %vm503_vm0, %v1163_v42, 0.0  ;;  %v1204_v8 = vrot.slane %v1203_v55, 2 }
 0x179   : > { %v1014_v49 = vpop.f32.mrf.mxu2  ;;  %v1032_v52 = vpop.f32.mrf.mxu3  ;;  %v1209_v51 = vrot.slane %v1208_v39, 4 }
 0x17a   : > { %v1045_v2 = vadd.f32 %v2512_v43, %v1014_v49  ;;  %v1052_v6 = vadd.f32 %v2512_v43, %v1032_v52  ;;  %v1258_v52 = vrot.slane %v1257_v40, 4 }
 0x17c   : > { %v1061_v9 = vmax.f32 %v1045_v2, 0.0  ;;  %v1068_v16 = vmax.f32 %v1052_v6, 0.0  ;;  %v1210_v2 = vadd.f32 %v1209_v51, %v1208_v39 }
 0x17e   : > { %v1157_v23 = vmul.f32 %v1108_v21, %v1061_v9  ;;  %v1164_v30 = vmul.f32 %v1143_v26, %v1068_v16  ;;  %v1211_v14 = vrot.slane %v1210_v2, 2  ;;  %v1198_v21 = vadd.f32 %v1197_v7, %v1196_v61 }
 0x17f   : > { %v1205_v26 = vadd.f32 %v1204_v8, %v1203_v55 }
 0x180   : > { %v1215_v47 = vsel %vm503_vm0, %v1157_v23, 0.0  ;;  %v1264_v25 = vsel %vm503_vm0, %v1164_v30, 0.0  ;;  %v1199_v39 = vrot.slane %v1198_v21, 1 }
 0x181   : > { %v1017_v56 = vpop.f32.mrf.mxu2  ;;  %v1034_v1 = vpop.f32.mrf.mxu3  ;;  %v1216_v59 = vrot.slane %v1215_v47, 4  ;;  %v1265_v62 = vrot.slane %v1264_v25, 4 }
 0x182   : > { %v1046_v19 = vadd.f32 %v2512_v43, %v1017_v56  ;;  %v1053_v3 = vadd.f32 %v2512_v43, %v1034_v1  ;;  %v1252_v1 = vadd.f32 %v1251_v48, %v1250_v36 }
 0x183   : > { %v1217_v6 = vadd.f32 %v1216_v59, %v1215_v47  ;;  %v1266_v57 = vadd.f32 %v1265_v62, %v1264_v25 }
 0x184   : > { %v1062_v4 = vmax.f32 %v1046_v19, 0.0  ;;  %v1069_v20 = vmax.f32 %v1053_v3, 0.0 }
 0x185   : > { %v1218_v18 = vrot.slane %v1217_v6, 2  ;;  %v1267_v22 = vrot.slane %v1266_v57, 2 }
 0x186   : > { %v1158_v12 = vmul.f32 %v1113_v37, %v1062_v4  ;;  %v1165_v37 = vmul.f32 %v1148_v33, %v1069_v20  ;;  %v1259_v4 = vadd.f32 %v1258_v52, %v1257_v40  ;;  %v1212_v33 = vadd.f32 %v1211_v14, %v1210_v2 }
 0x187   : > { %v1219_v35 = vadd.f32 %v1218_v18, %v1217_v6  ;;  %v1268_v40 = vadd.f32 %v1267_v22, %v1266_v57 }
 0x188   : > { %v1222_v32 = vsel %vm503_vm0, %v1158_v12, 0.0  ;;  %v1271_v56 = vsel %vm503_vm0, %v1165_v37, 0.0  ;;  %v1260_v16 = vrot.slane %v1259_v4, 2  ;;  %v1213_v46 = vrot.slane %v1212_v33, 1 }
 0x189   : > { %v1019_v31 = vpop.f32.mrf.mxu2  ;;  %v1223_v41 = vrot.slane %v1222_v32, 4  ;;  %v1272_v63 = vrot.slane %v1271_v56, 4  ;;  %v1220_v15 = vrot.slane %v1219_v35, 1  ;;  %v1269_v51 = vrot.slane %v1268_v40, 1 }
 0x18a   : > { %v1047_v13 = vadd.f32 %v2512_v43, %v1019_v31  ;;  %v1261_v34 = vadd.f32 %v1260_v16, %v1259_v4  ;;  %v1214_v61 = vadd.f32 %v1213_v46, %v1212_v33 }
 0x18b   : > { %v1224_v60 = vadd.f32 %v1223_v41, %v1222_v32  ;;  %v1273_v9 = vadd.f32 %v1272_v63, %v1271_v56  ;;  %v1206_v41 = vrot.slane %v1205_v26, 1  ;;  %v1221_v55 = vadd.f32 %v1220_v15, %v1219_v35 }
 0x18c   : > { %v1063_v54 = vmax.f32 %v1047_v13, 0.0  ;;  %v1253_v13 = vrot.slane %v1252_v1, 2  ;;  %v1270_v2 = vadd.f32 %v1269_v51, %v1268_v40 }
 0x18d   : > { %v1225_v27 = vrot.slane %v1224_v60, 2  ;;  %v1274_v23 = vrot.slane %v1273_v9, 2  ;;  %v1207_v52 = vadd.f32 %v1206_v41, %v1205_v26 }
 0x18e   : > { %v1159_v29 = vmul.f32 %v1118_v53, %v1063_v54 }
 0x18f   : > { %v1226_v20 = vadd.f32 %v1225_v27, %v1224_v60  ;;  %v1283_v4 = vpack.c.bf16 %v1207_v52, %v1207_v52 }
 0x190   : > { %v1229_v38 = vsel %vm503_vm0, %v1159_v29, 0.0 }
 0x191   : > { %v1230_v44 = vrot.slane %v1229_v38, 4  ;;  %v1022_v11 = vpop.f32.mrf.mxu2  ;;  %v1227_v36 = vrot.slane %v1226_v20, 1 }
 0x192   : > { %v1048_v53 = vadd.f32 %v2512_v43, %v1022_v11 }
 0x193   : > { %v1231_v49 = vadd.f32 %v1230_v44, %v1229_v38  ;;  %v1275_v44 = vadd.f32 %v1274_v23, %v1273_v9  ;;  %v1228_v48 = vadd.f32 %v1227_v36, %v1226_v20 }
 0x194   : > { %v1064_v19 = vmax.f32 %v1048_v53, 0.0  ;;  %v1262_v53 = vrot.slane %v1261_v34, 1 }
 0x195   : > { %v1232_v0 = vrot.slane %v1231_v49, 2  ;;  %v1276_v56 = vrot.slane %v1275_v44, 1  ;;  %v1286_v63 = vpack.c.bf16 %v1228_v48, %v1228_v48 }
 0x196   : > { %v1160_v24 = vmul.f32 %v2524_v58, %v1064_v19 }
 0x197   : > { %v1233_v12 = vadd.f32 %v1232_v0, %v1231_v49  ;;  %v1200_v49 = vadd.f32 %v1199_v39, %v1198_v21  ;;  %v1419_v8 = vunpack.c.l.b16 %v1286_v63  ;;  %v1346_v39 = vpop.permute.xlu2 %1345 }
 0x198   : > { %v1236_v5 = vsel %vm503_vm0, %v1160_v24, 0.0  ;;  %v1263_v24 = vadd.f32 %v1262_v53, %v1261_v34 }
 0x199   : > { %v1237_v28 = vrot.slane %v1236_v5, 4  ;;  %v1024_v3 = vpop.f32.mrf.mxu2  ;;  %v1234_v32 = vrot.slane %v1233_v12, 1 }
 0x19a   : > { %v1049_v31 = vadd.f32 %v2512_v43, %v1024_v3  ;;  %v1254_v43 = vadd.f32 %v1253_v13, %v1252_v1  ;;  %v1282_v1 = vpack.c.bf16 %v1200_v49, %v1200_v49  ;;  %v1284_v3 = vpack.c.bf16 %v1214_v61, %v1214_v61 }
 0x19b   : > { %v1238_v58 = vadd.f32 %v1237_v28, %v1236_v5  ;;  %v1235_v11 = vadd.f32 %v1234_v32, %v1233_v12  ;;  %v1277_v5 = vadd.f32 %v1276_v56, %v1275_v44  ;;  %v1291_v57 = vpack.c.bf16 %v1263_v24, %v1263_v24 }
 0x19c   : > { %v1065_v17 = vmax.f32 %v1049_v31, 0.0  ;;  %v1285_v31 = vpack.c.bf16 %v1221_v55, %v1221_v55  ;;  %v1415_v12 = vunpack.c.l.b16 %v1282_v1  ;;  %v1416_v13 = vunpack.c.l.b16 %v1283_v4 }
 0x19d   : > { %v1239_v54 = vrot.slane %v1238_v58, 2  ;;  %v1287_v19 = vpack.c.bf16 %v1235_v11, %v1235_v11  ;;  %v1293_v14 = vpack.c.bf16 %v1277_v5, %v1277_v5  ;;  %v1417_v20 = vunpack.c.l.b16 %v1284_v3 }
 0x19e   : > { %v1161_v42 = vmul.f32 %v2529_v50, %v1065_v17  ;;  %v1255_v50 = vrot.slane %v1254_v43, 1  ;;  %v1424_v21 = vunpack.c.l.b16 %v1291_v57  ;;  %v1418_v22 = vunpack.c.l.b16 %v1285_v31 }
 0x19f   : > { %v1240_v29 = vadd.f32 %v1239_v54, %v1238_v58  ;;  %v1420_v6 = vunpack.c.l.b16 %v1287_v19  ;;  %v1292_v58 = vpack.c.bf16 %v1270_v2, %v1270_v2  ;;  %v1434_v26 = vsel %vm1433_vm6, %v1415_v12, %v2527_v10  ;;  %v1301_v44 = vpop.permute.xlu2 %1300 }
 0x1a0   : > { %v1243_v30 = vsel %vm503_vm0, %v1161_v42, 0.0  ;;  %v1256_v60 = vadd.f32 %v1255_v50, %v1254_v43  ;;  %v1436_v43 = vsel %vm1435_vm7, %v1416_v13, %v1434_v26  ;;  %v2579_v50 = vld [vmem:[%s2705_s10] sm:$0xff] }
 0x1a1   : > { %v1241_v37 = vrot.slane %v1240_v29, 1  ;;  %v1244_v38 = vrot.slane %v1243_v30, 4  ;;  %v1441_v16 = vsel %vm1427_vm3, %v1420_v6, %v1419_v8  ;;  %v1425_v23 = vunpack.c.l.b16 %v1292_v58 }
 0x1a2   : > { %v1290_v28 = vpack.c.bf16 %v1256_v60, %v1256_v60  ;;  %v1438_v34 = vsel %vm1437_vm8, %v1417_v20, %v1436_v43  ;;  %v1378_v46 = vperm.slane %v2579_v50, 2 }
 0x1a3   : > { %v1245_v45 = vadd.f32 %v1244_v38, %v1243_v30  ;;  %v1242_v47 = vadd.f32 %v1241_v37, %v1240_v29  ;;  %v1426_v29 = vunpack.c.l.b16 %v1293_v14  ;;  %v1440_v35 = vsel %vm1439_vm9, %v1418_v22, %v1438_v34  ;;  %v1306_v37 = vpop.permute.xlu1 %1305  ;;  %v1311_v38 = vpop.permute.xlu0 %1310 }
 0x1a4   : > { %v1423_v18 = vunpack.c.l.b16 %v1290_v28  ;;  %v1381_v15 = vmul.f32 %v1378_v46, %v1311_v38  ;;  %v1379_v49 = vmul.f32 %v1378_v46, %v1301_v44  ;;  %v1388_v19 = vmul.f32 %v1378_v46, %v1346_v39  ;;  %v2152_v44 = vld [vmem:[%s2357_s26 + $0x8] sm:$0xff] }
 0x1a5   : > { %v1246_v25 = vrot.slane %v1245_v45, 2  ;;  %v1288_v62 = vpack.c.bf16 %v1242_v47, %v1242_v47  ;;  %v1380_v47 = vmul.f32 %v1378_v46, %v1306_v37 }
 0x1a6   : > { %v1479_v56 = vrot.slane %v1381_v15, 6  ;;  %v1491_v63 = vrot.slane %v1388_v19, 7 }
 0x1a7   : > { %v1247_v59 = vadd.f32 %v1246_v25, %v1245_v45  ;;  %v1421_v7 = vunpack.c.l.b16 %v1288_v62  ;;  %v1356_v53 = vpop.permute.xlu2 %1355  ;;  %v1477_v25 = vrot.slane %v1380_v47, 7 }
 0x1a8   : > { %v1390_v6 = vmul.f32 %v1378_v46, %v1356_v53 }
 0x1a9   : > { %v1248_v0 = vrot.slane %v1247_v59, 1  ;;  %v1442_v54 = vsel %vm1429_vm4, %v1421_v7, %v1441_v16 }
 0x1ab   : > { %v1249_v27 = vadd.f32 %v1248_v0, %v1247_v59  ;;  %v1351_v40 = vpop.permute.xlu1 %1350  ;;  %v1316_v41 = vpop.permute.xlu0 %1315  ;;  %v1478_v59 = vsel %vm1427_vm3, %v1477_v25, %v1379_v49 }
 0x1ac   : > { %v1382_v52 = vmul.f32 %v1378_v46, %v1316_v41  ;;  %v1389_v24 = vmul.f32 %v1378_v46, %v1351_v40  ;;  %v1480_v55 = vsel %vm1429_vm4, %v1479_v56, %v1478_v59 }
 0x1ad   : > { %v1289_v9 = vpack.c.bf16 %v1249_v27, %v1249_v27 }
 0x1ae   : > { %v1481_v61 = vrot.slane %v1382_v52, 5  ;;  %v1493_v27 = vrot.slane %v1389_v24, 6 }
 0x1af   : > { %v1422_v17 = vunpack.c.l.b16 %v1289_v9  ;;  %v1326_v62 = vpop.permute.xlu2 %1325  ;;  %v1495_v9 = vrot.slane %v1390_v6, 5 }
 0x1b0   : > { %v1384_v1 = vmul.f32 %v1378_v46, %v1326_v62  ;;  %v1482_v5 = vsel %vm1431_vm5, %v1481_v61, %v1480_v55 }
 0x1b1   : > { %v1443_v42 = vsel %vm1431_vm5, %v1422_v17, %v1442_v54 }
 0x1b2   : > { %v1444_v32 = vsel %vm1433_vm6, %v1423_v18, %v1443_v42  ;;  %v1485_v57 = vrot.slane %v1384_v1, 3  ;;  %v2068_v1 = vld [vmem:[%s2703_s8] sm:$0xff] }
 0x1b3   : > { %v1445_v33 = vsel %vm1435_vm7, %v1424_v21, %v1444_v32  ;;  %v1341_v11 = vpop.permute.xlu1 %1340  ;;  %v1321_v45 = vpop.permute.xlu0 %1320 }
 0x1b4   : > { %v1446_v30 = vsel %vm1437_vm8, %v1425_v23, %v1445_v33  ;;  %v1383_v60 = vmul.f32 %v1378_v46, %v1321_v45  ;;  %v1387_v0 = vmul.f32 %v1378_v46, %v1341_v11 }
 0x1b5   : > { %v1447_v36 = vsel %vm1439_vm9, %v1426_v29, %v1446_v30 }
 0x1b6   : > { %v1448_v10 = vpack.c.b16 %v1447_v36, %v1440_v35  ;;  %v1483_v2 = vrot.slane %v1383_v60, 4  ;;  %v1492_v7 = vsel %vm1427_vm3, %v1491_v63, %v1387_v0  ;;  %v2151_v35 = vld [vmem:[%s2357_s26] sm:$0xff]  ;;  %v2069_v63 = vld [vmem:[%s2703_s8 + $0x8] sm:$0xff] }
 0x1b7   : > { %v1494_v58 = vsel %vm1429_vm4, %v1493_v27, %v1492_v7  ;;  %v1371_v17 = vpop.permute.xlu2 %1370  ;;  %1621 = vmatpush.bf16.msra.mxu0 %v2069_v63 }
 0x1b8   : > { %2003 = vmatmul.msk.bf16.vlgmr.msrb.gmra.mxu3 %vm503_vm0, %v1448_v10  ;;  %v1484_v31 = vsel %vm1433_vm6, %v1483_v2, %v1482_v5  ;;  %v1496_v20 = vsel %vm1431_vm5, %v1495_v9, %v1494_v58  ;;  %v1393_v21 = vmul.f32 %v1378_v46, %v1371_v17  ;;  %v2077_v9 = vld [vmem:[%s2704_s9 + $0x38] sm:$0xff] }
 0x1b9   : > { %v1486_v16 = vsel %vm1435_vm7, %v1485_v57, %v1484_v31  ;;  %1697 = vmatpush.bf16.msra.mxu3 %v2077_v9 }
 0x1ba   : > { %v1501_v33 = vrot.slane %v1393_v21, 2  ;;  %v2075_v21 = vld [vmem:[%s2704_s9 + $0x28] sm:$0xff] }
 0x1bb   : > { %v1361_v48 = vpop.permute.xlu1 %1360  ;;  %v1366_v51 = vpop.permute.xlu0 %1365  ;;  %1622 = vmatpush.bf16.msra.mxu0 %v2068_v1 }
 0x1bc   : > { %v1391_v8 = vmul.f32 %v1378_v46, %v1361_v48  ;;  %v1392_v14 = vmul.f32 %v1378_v46, %v1366_v51 }
 0x1be   : > { %v1497_v18 = vrot.slane %v1391_v8, 4  ;;  %v1499_v26 = vrot.slane %v1392_v14, 3 }
 0x1c0   : > { %v1498_v23 = vsel %vm1433_vm6, %v1497_v18, %v1496_v20 }
 0x1c1   : > { %v1500_v30 = vsel %vm1435_vm7, %v1499_v26, %v1498_v23  ;;  %v2074_v23 = vld [vmem:[%s2704_s9 + $0x20] sm:$0xff] }
 0x1c2   : > { %v1502_v38 = vsel %vm1437_vm8, %v1501_v33, %v1500_v30  ;;  %v1583_v30 = vperm.slane %v2579_v50, 4 }
 0x1c3   : > { %v1331_v4 = vpop.permute.xlu1 %1330  ;;  %v1336_v3 = vpop.permute.xlu0 %1335 }
 0x1c4   : > { %v1385_v28 = vmul.f32 %v1378_v46, %v1331_v4  ;;  %v1386_v12 = vmul.f32 %v1378_v46, %v1336_v3 }
 0x1c6   : > { %v1487_v13 = vrot.slane %v1385_v28, 2  ;;  %v1489_v54 = vrot.slane %v1386_v12, 1 }
 0x1c8   : > { %v1488_v42 = vsel %vm1437_vm8, %v1487_v13, %v1486_v16  ;;  %v2076_v13 = vld [vmem:[%s2704_s9 + $0x30] sm:$0xff] }
 0x1c9   : > { %v1490_v29 = vsel %vm1439_vm9, %v1489_v54, %v1488_v42  ;;  %1698 = vmatpush.bf16.msra.mxu3 %v2076_v13 }
 0x1cb   : > { %v1376_v22 = vpop.permute.xlu1 %1375 }
 0x1cc   : > { %v1394_v32 = vmul.f32 %v1378_v46, %v1376_v22  ;;  %v2218_v46 = vmov 32.0  }
 0x1cd   : > { %2132 = vrcp.f32 %v2218_v46  ;;  %1699 = vmatpush.bf16.msra.mxu3 %v2075_v21  ;;  %v2072_v46 = vld [vmem:[%s2704_s9 + $0x10] sm:$0xff] }
 0x1ce   : > { %v1503_v10 = vrot.slane %v1394_v32, 1 }
 0x1d0   : > { %v1504_v39 = vsel %vm1439_vm9, %v1503_v10, %v1502_v38 }
 0x1d1   : > { %1700 = vmatpush.bf16.msra.mxu3 %v2074_v23 }
 0x1d3   : > { %v2133_v47 = vpop.eup %2132 }
 0x1d4   : > { %v1533_v53 = vmul.f32 32.0, %v2133_v47  ;;  %vm1537_vm10 = vweird.f32 %v2133_v47 }
 0x1d6   : > { %v1534_v15 = vsub.f32 1.0, %v1533_v53  ;;  %v2070_v53 = vld [vmem:[%s2704_s9] sm:$0xff] }
 0x1d8   : > { %v1535_v48 = vmul.f32 %v2133_v47, %v1534_v15 }
 0x1da   : > { %v1536_v25 = vadd.f32 %v2133_v47, %v1535_v48  ;;  %v2131_v48 = vld [vmem:[%s2706_s11] ss:$0 sm:$0xff] }
 0x1dc   : > { %v2600_v49 = vsel %vm1537_vm10, %v2133_v47, %v1536_v25  ;;  %v2071_v47 = vld [vmem:[%s2704_s9 + $0x8] sm:$0xff] }
 0x23b   : > { %v1519_v43 = vpop.f32.mrf.mxu3 }
 0x23c   : > { %v1520_v34 = vadd.f32 %v1519_v43, %v1490_v29 }
 0x23e   : > { %v1524_v36 = vadd.f32 %v2151_v35, %v1520_v34 }
 0x240   : > { %v1526_v37 = vsel %vm503_vm0, %v1524_v36, 0.0 }
 0x241   : > { %1527 = vadd.xlane.f32.xlu2 %v1526_v37 }
 0x243   : > { %v1521_v40 = vpop.f32.mrf.mxu3 }
 0x244   : > { %v1522_v41 = vadd.f32 %v1521_v40, %v1504_v39  ;;  %v1588_v39 = vperm.slane %v2579_v50, 5 }
 0x246   : > { %v1525_v11 = vadd.f32 %v2152_v44, %v1522_v41 }
 0x248   : > { %v1529_v45 = vsel %vm503_vm0, %v1525_v11, 0.0 }
 0x249   : > { %1530 = vadd.xlane.f32.xlu0 %v1529_v45  ;;  %v2073_v45 = vld [vmem:[%s2704_s9 + $0x18] sm:$0xff] }
 0x24a   : > { %1701 = vmatpush.bf16.msra.mxu3 %v2073_v45 }
 0x24e   : > { %1702 = vmatpush.bf16.msra.mxu3 %v2072_v46  ;;  %v1768_v46 = vperm.slane %v2579_v50, 7 }
 0x252   : > { %1703 = vmatpush.bf16.msra.mxu3 %v2071_v47 }
 0x256   : > { %1704 = vmatpush.bf16.msra.mxu3 %v2070_v53 }
 0x2b4   : > { %v1528_v51 = vpop.xlane.xlu2 %1527 }
 0x2b5   : > { %v1539_v52 = vmul.f32 %v2600_v49, %v1528_v51 }
 0x2b7   : > { %v2603_v56 = vsub.f32 %v1524_v36, %v1539_v52 }
 0x2b9   : > { %v1543_v19 = vmul.f32 %v2603_v56, %v2603_v56 }
 0x2bb   : > { %v1545_v59 = vsel %vm503_vm0, %v1543_v19, 0.0 }
 0x2bc   : > { %v1531_v60 = vpop.xlane.xlu0 %1530  ;;  %1546 = vadd.xlane.f32.xlu1 %v1545_v59 }
 0x2bd   : > { %v1540_v61 = vmul.f32 %v2600_v49, %v1531_v60  ;;  %v1648_v60 = vperm.slane %v2579_v50, 3 }
 0x2bf   : > { %v1542_v62 = vsub.f32 %v1525_v11, %v1540_v61 }
 0x2c1   : > { %v1544_v24 = vmul.f32 %v1542_v62, %v1542_v62 }
 0x2c3   : > { %v1548_v55 = vsel %vm503_vm0, %v1544_v24, 0.0 }
 0x2c4   : > { %1549 = vadd.xlane.f32.xlu2 %v1548_v55 }
 0x32f   : > { %v1547_v0 = vpop.xlane.xlu1 %1546 }
 0x330   : > { %v1551_v2 = vmul.f32 0.032258064, %v1547_v0 }
 0x332   : > { %v1553_v4 = vadd.f32 1e-06, %v1551_v2 }
 0x334   : > { %2134 = vrsqrt.f32 %v1553_v4  ;;  %vm1562_vm11 = vcmp.eq.f32.partialorder %v1553_v4, inf  ;;  %v1565_v17 = vand.u32 2147483648, %v1553_v4  ;;  %vm1564_vm12 = vcmp.eq.f32.partialorder %v1553_v4, 0.0 }
 0x337   : > { %v1550_v5 = vpop.xlane.xlu2 %1549 }
 0x338   : > { %v1552_v6 = vmul.f32 0.032258064, %v1550_v5 }
 0x33a   : > { %v2135_v27 = vpop.eup %2134  ;;  %v1554_v28 = vadd.f32 1e-06, %v1552_v6 }
 0x33b   : > { %v1556_v3 = vmul.f32 %v2135_v27, %v1553_v4 }
 0x33c   : > { %2136 = vrsqrt.f32 %v1554_v28  ;;  %vm1574_vm13 = vcmp.eq.f32.partialorder %v1554_v28, inf  ;;  %v1577_v29 = vand.u32 2147483648, %v1554_v28  ;;  %vm1576_vm14 = vcmp.eq.f32.partialorder %v1554_v28, 0.0 }
 0x33d   : > { %v1557_v7 = vmul.f32 %v2135_v27, %v1556_v3 }
 0x33f   : > { %v1558_v57 = vmul.f32 0.5, %v1557_v7 }
 0x341   : > { %v1559_v31 = vsub.f32 1.5, %v1558_v57 }
 0x342   : > { %v2137_v8 = vpop.eup %2136 }
 0x343   : > { %v1560_v12 = vmul.f32 %v2135_v27, %v1559_v31  ;;  %v1568_v58 = vmul.f32 %v2137_v8, %v1554_v28 }
 0x345   : > { %v1561_v14 = vmul.f32 %v1560_v12, %v1553_v4  ;;  %v1569_v16 = vmul.f32 %v2137_v8, %v1568_v58  ;;  %v1772_v12 = vld [vmem:[%s478_s18 + $0x8] sm:$0xff] }
 0x347   : > { %v1563_v18 = vsel %vm1562_vm11, %v1553_v4, %v1561_v14  ;;  %v1570_v20 = vmul.f32 0.5, %v1569_v16  ;;  %v1771_v4 = vld [vmem:[%s478_s18] sm:$0xff]  ;;  %s2169_s18 = scalar_lea.hbm %s2168_s17, 16 }
 0x348   : > { %v1566_v54 = vsel %vm1564_vm12, %v1565_v17, %v1563_v18  ;;  %p2170_p12 = scmp.ne.s32.totalorder %s2168_s17, %s2169_s18  ;;  %p2175_p2 = scmp.lt.s32.totalorder %s2173_s4, %s2169_s18 }
 0x349   : > { %v1571_v22 = vsub.f32 1.5, %v1570_v20  ;;  %v1579_v42 = vadd.f32 1e-06, %v1566_v54 }
 0x34a   : > { %p2171_p13 = pnand %p2170_p12, %p2321_p5  ;;  %p2176_p3 = por %p2175_p2, %p2174_p1 }
 0x34b   : > { %v1572_v26 = vmul.f32 %v2137_v8, %v1571_v22  ;;  %2138 = vrcp.f32 %v1579_v42 }
 0x34c   : > { %p2172_p0 = pneg %p2171_p13 }
 0x34d   : > { %v1573_v32 = vmul.f32 %v1572_v26, %v1554_v28 }
 0x34e   : > { %p2177_p4 = pnand %p2176_p3, %p2172_p0 }
 0x34f   : > { %v1575_v43 = vsel %vm1574_vm13, %v1554_v28, %v1573_v32 }
 0x350   : > { %v1578_v33 = vsel %vm1576_vm14, %v1577_v29, %v1575_v43 }
 0x351   : > { %v1580_v34 = vadd.f32 1e-06, %v1578_v33  ;;  %v2139_v35 = vpop.eup %2138 }
 0x352   : > { %v1584_v36 = vmul.f32 %v2139_v35, %v1583_v30 }
 0x353   : > { %2140 = vrcp.f32 %v1580_v34 }
 0x354   : > { %v1586_v38 = vmul.f32 %v1584_v36, %v2603_v56 }
 0x356   : > { %v1589_v41 = vadd.f32 %v1588_v39, %v1586_v38  ;;  %v1763_v38 = vperm.slane %v2579_v50, 6 }
 0x359   : > { %v2141_v10 = vpop.eup %2140 }
 0x35a   : > { %v1585_v37 = vmul.f32 %v2141_v10, %v1583_v30 }
 0x35c   : > { %v1587_v40 = vmul.f32 %v1585_v37, %v1542_v62 }
 0x35e   : > { %v1590_v44 = vadd.f32 %v1588_v39, %v1587_v40 }
 0x360   : > { %v1591_v11 = vpack.c.bf16 %v1590_v44, %v1589_v41 }
 0x362   : > { %2012 = vmatmul.msk.bf16.vlgmr.msra.gmra.mxu0 %vm503_vm0, %v1591_v11 }
 0x3df   : > { %v1624_v15 = vpop.f32.mrf.mxu0 }
 0x3e0   : > { %v1625_v25 = vadd.f32 %v2131_v48, %v1624_v15 }
 0x3e2   : > { %v1629_v56 = vmax.f32 %v1625_v25, 0.0 }
 0x3e7   : > { %v1626_v51 = vpop.f32.mrf.mxu0 }
 0x3e8   : > { %v1627_v52 = vadd.f32 %v2131_v48, %v1626_v51 }
 0x3ea   : > { %v1630_v19 = vmax.f32 %v1627_v52, 0.0 }
 0x3ec   : > { %v1631_v59 = vpack.c.bf16 %v1630_v19, %v1629_v56 }
 0x3ee   : > { %1705 = vmatmul.bf16.vlgmr.msra.gmra.mxu3 %v1631_v59 }
 0x471   : > { %v1706_v61 = vpop.f32.mrf.mxu3 }
 0x472   : > { %v1707_v62 = vadd.f32 %v1706_v61, %v1648_v60 }
 0x474   : > { %v1711_v24 = vadd.f32 %v1707_v62, %v1589_v41 }
 0x476   : > { %v1713_v55 = vsel %vm503_vm0, %v1711_v24, 0.0 }
 0x477   : > { %1714 = vadd.xlane.f32.xlu2 %v1713_v55 }
 0x479   : > { %v1708_v63 = vpop.f32.mrf.mxu3 }
 0x47a   : > { %v1709_v0 = vadd.f32 %v1708_v63, %v1648_v60 }
 0x47c   : > { %v1712_v1 = vadd.f32 %v1709_v0, %v1590_v44 }
 0x47e   : > { %v1716_v2 = vsel %vm503_vm0, %v1712_v1, 0.0 }
 0x47f   : > { %1717 = vadd.xlane.f32.xlu0 %v1716_v2 }
 0x493   : > { %1775 = vperm.xlu0 %2128, %v1771_v4  }
 0x4ea   : > { %v1715_v5 = vpop.xlane.xlu2 %1714 }
 0x4eb   : > { %v1719_v6 = vmul.f32 %v1715_v5, %v2600_v49 }
 0x4ed   : > { %v1721_v27 = vsub.f32 %v1711_v24, %v1719_v6 }
 0x4ef   : > { %v1723_v28 = vmul.f32 %v1721_v27, %v1721_v27 }
 0x4f1   : > { %v1725_v3 = vsel %vm503_vm0, %v1723_v28, 0.0 }
 0x4f2   : > { %v1718_v7 = vpop.xlane.xlu0 %1717  ;;  %1726 = vadd.xlane.f32.xlu1 %v1725_v3 }
 0x4f3   : > { %v1720_v57 = vmul.f32 %v1718_v7, %v2600_v49 }
 0x4f5   : > { %v1722_v31 = vsub.f32 %v1712_v1, %v1720_v57 }
 0x4f7   : > { %v1724_v8 = vmul.f32 %v1722_v31, %v1722_v31 }
 0x4f9   : > { %v1728_v9 = vsel %vm503_vm0, %v1724_v8, 0.0 }
 0x4fa   : > { %1729 = vadd.xlane.f32.xlu2 %v1728_v9 }
 0x505   : > { %v1776_v15 = vpop.permute.xlu0 %1775 }
 0x50b   : > { %1780 = vperm.xlu1 %2129, %v1772_v12  }
 0x565   : > { %v1727_v58 = vpop.xlane.xlu1 %1726 }
 0x566   : > { %v1731_v13 = vmul.f32 0.032258064, %v1727_v58 }
 0x568   : > { %v1733_v14 = vadd.f32 1e-06, %v1731_v13 }
 0x56a   : > { %2142 = vrsqrt.f32 %v1733_v14  ;;  %vm1742_vm15 = vcmp.eq.f32.partialorder %v1733_v14, inf  ;;  %v1745_v43 = vand.u32 2147483648, %v1733_v14  ;;  %vm1744_vm1 = vcmp.eq.f32.partialorder %v1733_v14, 0.0 }
 0x56d   : > { %v1730_v16 = vpop.xlane.xlu2 %1729 }
 0x56e   : > { %v1732_v17 = vmul.f32 0.032258064, %v1730_v16 }
 0x570   : > { %v2143_v18 = vpop.eup %2142  ;;  %v1734_v20 = vadd.f32 1e-06, %v1732_v17 }
 0x571   : > { %v1736_v54 = vmul.f32 %v2143_v18, %v1733_v14 }
 0x572   : > { %2144 = vrsqrt.f32 %v1734_v20  ;;  %vm1754_vm2 = vcmp.eq.f32.partialorder %v1734_v20, inf  ;;  %v1757_v39 = vand.u32 2147483648, %v1734_v20  ;;  %vm1756_vm3 = vcmp.eq.f32.partialorder %v1734_v20, 0.0 }
 0x573   : > { %v1737_v21 = vmul.f32 %v2143_v18, %v1736_v54 }
 0x575   : > { %v1738_v22 = vmul.f32 0.5, %v1737_v21 }
 0x577   : > { %v1739_v49 = vsub.f32 1.5, %v1738_v22 }
 0x578   : > { %v2145_v42 = vpop.eup %2144 }
 0x579   : > { %v1748_v26 = vmul.f32 %v2145_v42, %v1734_v20  ;;  %v1740_v23 = vmul.f32 %v2143_v18, %v1739_v49 }
 0x57b   : > { %v1741_v32 = vmul.f32 %v1740_v23, %v1733_v14  ;;  %v1749_v29 = vmul.f32 %v2145_v42, %v1748_v26 }
 0x57d   : > { %v1743_v33 = vsel %vm1742_vm15, %v1733_v14, %v1741_v32  ;;  %v1750_v34 = vmul.f32 0.5, %v1749_v29  ;;  %v1781_v56 = vpop.permute.xlu1 %1780 }
 0x57e   : > { %v1746_v30 = vsel %vm1744_vm1, %v1745_v43, %v1743_v33 }
 0x57f   : > { %v1759_v35 = vadd.f32 1e-06, %v1746_v30  ;;  %v1751_v36 = vsub.f32 1.5, %v1750_v34 }
 0x581   : > { %2146 = vrcp.f32 %v1759_v35  ;;  %v1752_v10 = vmul.f32 %v2145_v42, %v1751_v36 }
 0x583   : > { %v1753_v37 = vmul.f32 %v1752_v10, %v1734_v20 }
 0x585   : > { %v1755_v40 = vsel %vm1754_vm2, %v1734_v20, %v1753_v37 }
 0x586   : > { %v1758_v41 = vsel %vm1756_vm3, %v1757_v39, %v1755_v40 }
 0x587   : > { %v2147_v44 = vpop.eup %2146  ;;  %v1760_v11 = vadd.f32 1e-06, %v1758_v41 }
 0x588   : > { %v1764_v45 = vmul.f32 %v2147_v44, %v1763_v38 }
 0x589   : > { %2148 = vrcp.f32 %v1760_v11 }
 0x58a   : > { %v1766_v47 = vmul.f32 %v1764_v45, %v1721_v27 }
 0x58c   : > { %v1769_v53 = vadd.f32 %v1768_v46, %v1766_v47 }
 0x58e   : > { %v1783_v48 = vmul.f32 %v1776_v15, %v1769_v53 }
 0x58f   : > { %v2149_v25 = vpop.eup %2148 }
 0x590   : > { %v1765_v51 = vmul.f32 %v2149_v25, %v1763_v38  ;;  %1785 = vst.msk [vmem:[%s455_s25] sm:$0xff] %vm503_vm0, %v1783_v48 }
 0x592   : > { %v1767_v52 = vmul.f32 %v1765_v51, %v1722_v31 }
 0x594   : > { %v1770_v50 = vadd.f32 %v1768_v46, %v1767_v52 }
 0x596   : > { %v1784_v19 = vmul.f32 %v1781_v56, %v1770_v50 }
 0x598   : > { %1786 = vst.msk [vmem:[%s455_s25 + $0x8] sm:$0xff] %vm503_vm0, %v1784_v19 }
 0x599   : > { %2180 = shalt.err (!%p2177_p4)
}
 0x59a   : > { %s2219_s19 = smov 128   ;;  %s2220_s25 = smov 8  }
 0x59b   : > { %2085 = dma.vmem_to_hbm [thread:$0]  (%p2321_p5), %s1801_s28, 256, %s1803_s29, %s1788_s15, %s2219_s19, %s2219_s19, %s2220_s25  }
 0x59c PF: > { %p2091_p7 = scmp.ge.s32.totalorder %s2215_s24, 2  ;;  %s1817_s16 = sand.u32 1, %s2203_s21  }
 0x59d   : > { %s1818_s20 = scalar_lea.sflag [#allocation3], %s1817_s16 }
 0x59e   : > { %p2088_p8 = pnand %p2091_p7, %p2325_p6 }
 0x5a0   : > { %p2089_p9 = pneg %p2088_p8 }
 0x5a2   : > { %2198 = dma.done.wait (%p2089_p9), %s1818_s20, 256  }
 0x5a3   : > { %2200 = vsyncadd (%p2089_p9), %s1818_s20, 4294967040  ;;  %s2713_s17 = sld [smem:[#allocation5_spill]]  ;;  %p22_p10 = scmp.ge.s32.totalorder %s2309_s27, 4  }
 0x5a4   : > { %s2714_s21 = smov %s2207_s22  ;;  %s2715_s22 = smov %s2211_s23 }
 0x5a5   : > { %s2717_s24 = smov %s2309_s27  ;;  %24 = sbr.rel (!%p22_p10) target bundleno = 5 (0x5), region = 112 }
 0x5a9   : > { %s2716_s23 = smov %s2713_s17 }
 0x5aa   :  { %1824 = vsyncpa [#allocation3], 1 }
 0x5ab   :  { %1826 = vsyncpa [#allocation3 + $0x1], 1 }

</bundles_post_ra>
